<compile_context>
chip_gen: v5e
topology: v5e:2x2
jax: 0.10.0
libtpu: 0.0.40
codegen_flags: <defaults>
</compile_context>

<pallas_src>
import functools
import math

import jax
import jax.numpy as jnp
from jax.experimental import pallas as pl
from jax.experimental.pallas import tpu as pltpu

# ---- module hyper-parameters (consistent with the PyTorch module) ----
X_SIZE = 16     # model.x_size
Z_SIZE = 8      # model.z_size
H_ENC = 200     # fc1/fc2 hidden width (fixed by the module)
H_FLOW = 100    # per-flow hidden width (fixed by the module)
N_FLOWS = 2     # hyper_config['n_flows']

_LOG2PI = math.log(2.0 * math.pi)


def _vmem():
    return pl.BlockSpec(memory_space=pltpu.MemorySpace.VMEM)


# -----------------------------------------------------------------------------
# Fused kernel: encoder -> reparam -> logqz -> N_FLOWS coupling flows (each =
# two half-steps sharing one Linear stack, exactly as the PyTorch norm_flow)
# -> logqz - logdetsum.
# -----------------------------------------------------------------------------
def _fused_flow1_kernel(P, B,
                        x_ref, eps_ref,
                        w1_ref, b1_ref, w2_ref, b2_ref,
                        w3m_ref, b3m_ref, w3v_ref, b3v_ref,
                        fw0_ref, fb0_ref, fw1_ref, fb1_ref, fw2_ref, fb2_ref,
                        z_ref, logprob_ref):
    n_rows = P * B

    # ---------------- encoder: fc1 -> tanh -> fc2 -> tanh -> fc3 -------------
    # bf16 MXU operands, f32 accumulation; elementwise math stays f32.
    x = x_ref[...].astype(jnp.bfloat16)                                    # [B, X]
    h1 = jnp.tanh(jnp.dot(x, w1_ref[...],
                          preferred_element_type=jnp.float32) + b1_ref[...])
    h2 = jnp.tanh(jnp.dot(h1.astype(jnp.bfloat16), w2_ref[...],
                          preferred_element_type=jnp.float32) + b2_ref[...])
    h2b = h2.astype(jnp.bfloat16)
    mean = jnp.dot(h2b, w3m_ref[...],
                   preferred_element_type=jnp.float32) + b3m_ref[...]      # [B, Z]
    logvar = jnp.dot(h2b, w3v_ref[...],
                     preferred_element_type=jnp.float32) + b3v_ref[...]    # [B, Z]

    # ---------------- reparameterization ----------------
    # Rows ordered p*B + b (matches eps.reshape(P*B, Z) in the wrapper and the
    # PyTorch z.view(-1, z_size)).
    std = jnp.exp(0.5 * logvar)                                            # [B, Z]
    mean_t = jnp.broadcast_to(mean[None], (P, B, Z_SIZE)).reshape(n_rows, Z_SIZE)
    std_t = jnp.broadcast_to(std[None], (P, B, Z_SIZE)).reshape(n_rows, Z_SIZE)

    eps = eps_ref[...]                                                     # [P*B, Z]
    z = eps * std_t + mean_t                                               # [P*B, Z]

    # logqz = lognormal(z, mean, logvar):  (z - mean)^2 * exp(-logvar) == eps^2
    sumlv = jnp.sum(logvar, axis=1, keepdims=True)                         # [B, 1]
    sumlv_t = jnp.broadcast_to(sumlv[None], (P, B, 1)).reshape(n_rows, 1)  # [P*B, 1]
    logqz = -0.5 * (Z_SIZE * _LOG2PI + sumlv_t
                    + jnp.sum(eps * eps, axis=1, keepdims=True))           # [P*B, 1]

    # ---------------- normalizing flows (statically unrolled) ----------------
    col = jax.lax.broadcasted_iota(jnp.int32, (n_rows, Z_SIZE), 1)
    mask_first = (col < (Z_SIZE // 2)).astype(jnp.float32)   # ones on 1st half

    def half_step(z_in, mask, w0, b0, wm, bm, ws, bs):
        z1 = z_in * mask
        h = jnp.tanh(jnp.dot(z1.astype(jnp.bfloat16), w0,
                             preferred_element_type=jnp.float32) + b0)     # [N, H]
        hb = h.astype(jnp.bfloat16)
        mew = jnp.dot(hb, wm, preferred_element_type=jnp.float32) + bm     # [N, Z]
        sig = jax.nn.sigmoid(
            jnp.dot(hb, ws, preferred_element_type=jnp.float32) + bs + 5.0)
        inv = 1.0 - mask
        z_new = z1 + (z_in * sig + mew) * inv
        logdet = jnp.sum(inv * jnp.log(sig), axis=1, keepdims=True)        # [N, 1]
        return z_new, logdet

    logdetsum = jnp.zeros((n_rows, 1), jnp.float32)
    for i in range(N_FLOWS):            # static unroll; both half-steps share params
        w0, b0 = fw0_ref[i], fb0_ref[i]
        wm, bm = fw1_ref[i], fb1_ref[i]
        ws, bs = fw2_ref[i], fb2_ref[i]
        z, ld1 = half_step(z, mask_first, w0, b0, wm, bm, ws, bs)
        z, ld2 = half_step(z, 1.0 - mask_first, w0, b0, wm, bm, ws, bs)
        logdetsum = logdetsum + ld1 + ld2

    z_ref[...] = z
    logprob_ref[...] = logqz - logdetsum


# -----------------------------------------------------------------------------
# Parameter construction (PyTorch-Linear-style uniform init; weights stored as
# [in, out] since the kernel computes x @ W + b) and one-time packing.
# -----------------------------------------------------------------------------
def _linear_params(key, fan_in, fan_out):
    kw, kb = jax.random.split(key)
    bound = 1.0 / math.sqrt(fan_in)
    w = jax.random.uniform(kw, (fan_in, fan_out), jnp.float32, -bound, bound)
    b = jax.random.uniform(kb, (1, fan_out), jnp.float32, -bound, bound)
    return w, b


def make_params(key):
    keys = jax.random.split(key, 3 + 3 * N_FLOWS)
    p = {}
    p["fc1"] = _linear_params(keys[0], X_SIZE, H_ENC)
    p["fc2"] = _linear_params(keys[1], H_ENC, H_ENC)
    p["fc3"] = _linear_params(keys[2], H_ENC, 2 * Z_SIZE)
    p["flows"] = []
    for i in range(N_FLOWS):
        l0 = _linear_params(keys[3 + 3 * i + 0], Z_SIZE, H_FLOW)   # z1 -> h
        l1 = _linear_params(keys[3 + 3 * i + 1], H_FLOW, Z_SIZE)   # h -> mew
        l2 = _linear_params(keys[3 + 3 * i + 2], H_FLOW, Z_SIZE)   # h -> sigma logits
        p["flows"].append((l0, l1, l2))
    return p


def pack_params(params):
    """bf16 matmul weights (f32 biases), split fc3, stacked flow params."""
    (w1, b1), (w2, b2), (w3, b3) = params["fc1"], params["fc2"], params["fc3"]
    bf = jnp.bfloat16
    packed = {
        "w1": w1.astype(bf), "b1": b1,
        "w2": w2.astype(bf), "b2": b2,
        "w3m": w3[:, :Z_SIZE].astype(bf), "b3m": b3[:, :Z_SIZE],
        "w3v": w3[:, Z_SIZE:].astype(bf), "b3v": b3[:, Z_SIZE:],
        "fw0": jnp.stack([f[0][0] for f in params["flows"]]).astype(bf),  # [F, Z, H]
        "fb0": jnp.stack([f[0][1] for f in params["flows"]]),             # [F, 1, H]
        "fw1": jnp.stack([f[1][0] for f in params["flows"]]).astype(bf),  # [F, H, Z]
        "fb1": jnp.stack([f[1][1] for f in params["flows"]]),             # [F, 1, Z]
        "fw2": jnp.stack([f[2][0] for f in params["flows"]]).astype(bf),  # [F, H, Z]
        "fb2": jnp.stack([f[2][1] for f in params["flows"]]),             # [F, 1, Z]
    }
    return packed


# -----------------------------------------------------------------------------
# flow1.forward equivalent.
# -----------------------------------------------------------------------------
def flow1_forward(k, x, packed, rng_key, logposterior=None):
    # logposterior is unused by the original forward pass; kept for parity.
    B = x.shape[0]
    n_rows = k * B

    # eps ~ N(0, I), rows ordered p*B + b (matches torch.FloatTensor(k,B,Z).normal_()).
    eps = jax.random.normal(rng_key, (k, B, Z_SIZE), jnp.float32).reshape(n_rows, Z_SIZE)

    # Advisory cost estimate so XLA overlaps neighbors with this short call.
    flops = 2 * B * (X_SIZE * H_ENC + H_ENC * H_ENC + 2 * H_ENC * Z_SIZE)
    flops += 2 * N_FLOWS * 2 * n_rows * (Z_SIZE * H_FLOW + 2 * H_FLOW * Z_SIZE)
    transcendentals = (2 * B * H_ENC + B * Z_SIZE
                       + 2 * N_FLOWS * n_rows * (H_FLOW + 2 * Z_SIZE))
    inputs = (x, eps,
              packed["w1"], packed["b1"], packed["w2"], packed["b2"],
              packed["w3m"], packed["b3m"], packed["w3v"], packed["b3v"],
              packed["fw0"], packed["fb0"], packed["fw1"], packed["fb1"],
              packed["fw2"], packed["fb2"])
    bytes_accessed = sum(int(a.size) * a.dtype.itemsize for a in inputs)
    bytes_accessed += n_rows * (Z_SIZE + 1) * 4

    kernel = functools.partial(_fused_flow1_kernel, k, B)
    z_flat, logprob_flat = pl.pallas_call(
        kernel,
        out_shape=(jax.ShapeDtypeStruct((n_rows, Z_SIZE), jnp.float32),
                   jax.ShapeDtypeStruct((n_rows, 1), jnp.float32)),
        in_specs=[_vmem()] * len(inputs),
        out_specs=(_vmem(), _vmem()),
        cost_estimate=pl.CostEstimate(flops=flops,
                                      transcendentals=transcendentals,
                                      bytes_accessed=bytes_accessed),
    )(*inputs)

    z = z_flat.reshape(k, B, Z_SIZE)
    logprob = logprob_flat.reshape(k, B)
    return z, logprob


if __name__ == "__main__":
    key = jax.random.PRNGKey(0)
    k_params, k_x, k_eps = jax.random.split(key, 3)

    B = 4
    P = 3  # number of samples k
    x = jax.random.normal(k_x, (B, X_SIZE), jnp.float32)
    params = make_params(k_params)
    packed = pack_params(params)

    z, logprob = flow1_forward(P, x, packed, k_eps)
    jax.block_until_ready((z, logprob))

    assert z.shape == (P, B, Z_SIZE), z.shape
    assert logprob.shape == (P, B), logprob.shape
    assert bool(jnp.all(jnp.isfinite(z))) and bool(jnp.all(jnp.isfinite(logprob)))

    print("KERNEL_OK")
</pallas_src>

<mosaic_0001>
module attributes {stable_mosaic.version = 11 : i64} {
  func.func @_fused_flow1_kernel(%arg0: memref<4x16xf32, #tpu.memory_space<vmem>>, %arg1: memref<12x8xf32, #tpu.memory_space<vmem>>, %arg2: memref<16x200xbf16, #tpu.memory_space<vmem>>, %arg3: memref<1x200xf32, #tpu.memory_space<vmem>>, %arg4: memref<200x200xbf16, #tpu.memory_space<vmem>>, %arg5: memref<1x200xf32, #tpu.memory_space<vmem>>, %arg6: memref<200x8xbf16, #tpu.memory_space<vmem>>, %arg7: memref<1x8xf32, #tpu.memory_space<vmem>>, %arg8: memref<200x8xbf16, #tpu.memory_space<vmem>>, %arg9: memref<1x8xf32, #tpu.memory_space<vmem>>, %arg10: memref<2x8x100xbf16, #tpu.memory_space<vmem>>, %arg11: memref<2x1x100xf32, #tpu.memory_space<vmem>>, %arg12: memref<2x100x8xbf16, #tpu.memory_space<vmem>>, %arg13: memref<2x1x8xf32, #tpu.memory_space<vmem>>, %arg14: memref<2x100x8xbf16, #tpu.memory_space<vmem>>, %arg15: memref<2x1x8xf32, #tpu.memory_space<vmem>>, %arg16: memref<12x8xf32, #tpu.memory_space<vmem>>, %arg17: memref<12x1xf32, #tpu.memory_space<vmem>>) attributes {dimension_semantics = [], scalar_prefetch = 0 : i64, scratch_operands = 0 : i64, tpu.core_type = #tpu.core_type<tc>} {
    %c0 = arith.constant 0 : index
    %c0_0 = arith.constant 0 : index
    %0 = vector.load %arg0[%c0, %c0_0] : memref<4x16xf32, #tpu.memory_space<vmem>>, vector<4x16xf32>
    %1 = arith.truncf %0 : vector<4x16xf32> to vector<4x16xbf16>
    %c0_1 = arith.constant 0 : index
    %c0_2 = arith.constant 0 : index
    %2 = vector.load %arg2[%c0_1, %c0_2] : memref<16x200xbf16, #tpu.memory_space<vmem>>, vector<16x200xbf16>
    %cst = arith.constant dense<0.000000e+00> : vector<4x200xf32>
    %3 = tpu.matmul %1, %2, %cst {dimension_numbers = #tpu.dot_dimension_numbers<[1], [0], [0], [1], [0, 0, 1, 1], [], []>} : vector<4x16xbf16>, vector<16x200xbf16>, vector<4x200xf32> -> vector<4x200xf32>
    %c0_3 = arith.constant 0 : index
    %c0_4 = arith.constant 0 : index
    %4 = vector.load %arg3[%c0_3, %c0_4] : memref<1x200xf32, #tpu.memory_space<vmem>>, vector<1x200xf32>
    %5 = vector.broadcast %4 : vector<1x200xf32> to vector<4x200xf32>
    %6 = arith.addf %3, %5 : vector<4x200xf32>
    %7 = math.tanh %6 : vector<4x200xf32>
    %8 = arith.truncf %7 : vector<4x200xf32> to vector<4x200xbf16>
    %c0_5 = arith.constant 0 : index
    %c0_6 = arith.constant 0 : index
    %9 = vector.load %arg4[%c0_5, %c0_6] : memref<200x200xbf16, #tpu.memory_space<vmem>>, vector<200x200xbf16>
    %cst_7 = arith.constant dense<0.000000e+00> : vector<4x200xf32>
    %10 = tpu.matmul %8, %9, %cst_7 {dimension_numbers = #tpu.dot_dimension_numbers<[1], [0], [0], [1], [0, 0, 1, 1], [], []>} : vector<4x200xbf16>, vector<200x200xbf16>, vector<4x200xf32> -> vector<4x200xf32>
    %c0_8 = arith.constant 0 : index
    %c0_9 = arith.constant 0 : index
    %11 = vector.load %arg5[%c0_8, %c0_9] : memref<1x200xf32, #tpu.memory_space<vmem>>, vector<1x200xf32>
    %12 = vector.broadcast %11 : vector<1x200xf32> to vector<4x200xf32>
    %13 = arith.addf %10, %12 : vector<4x200xf32>
    %14 = math.tanh %13 : vector<4x200xf32>
    %15 = arith.truncf %14 : vector<4x200xf32> to vector<4x200xbf16>
    %c0_10 = arith.constant 0 : index
    %c0_11 = arith.constant 0 : index
    %16 = vector.load %arg6[%c0_10, %c0_11] : memref<200x8xbf16, #tpu.memory_space<vmem>>, vector<200x8xbf16>
    %cst_12 = arith.constant dense<0.000000e+00> : vector<4x8xf32>
    %17 = tpu.matmul %15, %16, %cst_12 {dimension_numbers = #tpu.dot_dimension_numbers<[1], [0], [0], [1], [0, 0, 1, 1], [], []>} : vector<4x200xbf16>, vector<200x8xbf16>, vector<4x8xf32> -> vector<4x8xf32>
    %c0_13 = arith.constant 0 : index
    %c0_14 = arith.constant 0 : index
    %18 = vector.load %arg7[%c0_13, %c0_14] : memref<1x8xf32, #tpu.memory_space<vmem>>, vector<1x8xf32>
    %19 = vector.broadcast %18 : vector<1x8xf32> to vector<4x8xf32>
    %20 = arith.addf %17, %19 : vector<4x8xf32>
    %c0_15 = arith.constant 0 : index
    %c0_16 = arith.constant 0 : index
    %21 = vector.load %arg8[%c0_15, %c0_16] : memref<200x8xbf16, #tpu.memory_space<vmem>>, vector<200x8xbf16>
    %cst_17 = arith.constant dense<0.000000e+00> : vector<4x8xf32>
    %22 = tpu.matmul %15, %21, %cst_17 {dimension_numbers = #tpu.dot_dimension_numbers<[1], [0], [0], [1], [0, 0, 1, 1], [], []>} : vector<4x200xbf16>, vector<200x8xbf16>, vector<4x8xf32> -> vector<4x8xf32>
    %c0_18 = arith.constant 0 : index
    %c0_19 = arith.constant 0 : index
    %23 = vector.load %arg9[%c0_18, %c0_19] : memref<1x8xf32, #tpu.memory_space<vmem>>, vector<1x8xf32>
    %24 = vector.broadcast %23 : vector<1x8xf32> to vector<4x8xf32>
    %25 = arith.addf %22, %24 : vector<4x8xf32>
    %cst_20 = arith.constant 5.000000e-01 : f32
    %26 = vector.broadcast %cst_20 : f32 to vector<4x8xf32>
    %27 = arith.mulf %26, %25 : vector<4x8xf32>
    %28 = math.exp %27 : vector<4x8xf32>
    %29 = vector.shape_cast %20 : vector<4x8xf32> to vector<1x4x8xf32>
    %30 = vector.shape_cast %29 : vector<1x4x8xf32> to vector<1x4x8xf32>
    %31 = vector.broadcast %30 : vector<1x4x8xf32> to vector<3x4x8xf32>
    %32 = vector.shape_cast %31 : vector<3x4x8xf32> to vector<12x8xf32>
    %33 = vector.shape_cast %28 : vector<4x8xf32> to vector<1x4x8xf32>
    %34 = vector.shape_cast %33 : vector<1x4x8xf32> to vector<1x4x8xf32>
    %35 = vector.broadcast %34 : vector<1x4x8xf32> to vector<3x4x8xf32>
    %36 = vector.shape_cast %35 : vector<3x4x8xf32> to vector<12x8xf32>
    %c0_21 = arith.constant 0 : index
    %c0_22 = arith.constant 0 : index
    %37 = vector.load %arg1[%c0_21, %c0_22] : memref<12x8xf32, #tpu.memory_space<vmem>>, vector<12x8xf32>
    %38 = arith.mulf %37, %36 : vector<12x8xf32>
    %39 = arith.addf %38, %32 : vector<12x8xf32>
    %cst_23 = arith.constant dense<0.000000e+00> : vector<4xf32>
    %40 = vector.multi_reduction <add>, %25, %cst_23 [1] : vector<4x8xf32> to vector<4xf32>
    %41 = vector.shape_cast %40 : vector<4xf32> to vector<4x1xf32>
    %42 = vector.shape_cast %41 : vector<4x1xf32> to vector<1x4x1xf32>
    %43 = vector.shape_cast %42 : vector<1x4x1xf32> to vector<1x4x1xf32>
    %44 = vector.broadcast %43 : vector<1x4x1xf32> to vector<3x4x1xf32>
    %45 = vector.shape_cast %44 : vector<3x4x1xf32> to vector<12x1xf32>
    %cst_24 = arith.constant 14.7030163 : f32
    %46 = vector.broadcast %cst_24 : f32 to vector<12x1xf32>
    %47 = arith.addf %46, %45 : vector<12x1xf32>
    %48 = arith.mulf %37, %37 : vector<12x8xf32>
    %cst_25 = arith.constant dense<0.000000e+00> : vector<12xf32>
    %49 = vector.multi_reduction <add>, %48, %cst_25 [1] : vector<12x8xf32> to vector<12xf32>
    %50 = vector.shape_cast %49 : vector<12xf32> to vector<12x1xf32>
    %51 = arith.addf %47, %50 : vector<12x1xf32>
    %cst_26 = arith.constant -5.000000e-01 : f32
    %52 = vector.broadcast %cst_26 : f32 to vector<12x1xf32>
    %53 = arith.mulf %52, %51 : vector<12x1xf32>
    %54 = tpu.iota {dimensions = array<i32: 1>} : vector<12x8xi32>
    %c4_i32 = arith.constant 4 : i32
    %55 = vector.broadcast %c4_i32 : i32 to vector<12x8xi32>
    %56 = arith.cmpi slt, %54, %55 : vector<12x8xi32>
    %57 = arith.extui %56 : vector<12x8xi1> to vector<12x8xi32>
    %58 = arith.sitofp %57 : vector<12x8xi32> to vector<12x8xf32>
    %cst_27 = arith.constant 0.000000e+00 : f32
    %59 = vector.broadcast %cst_27 : f32 to vector<12x1xf32>
    %c0_28 = arith.constant 0 : index
    %c0_29 = arith.constant 0 : index
    %c0_30 = arith.constant 0 : index
    %60 = vector.load %arg10[%c0_28, %c0_29, %c0_30] : memref<2x8x100xbf16, #tpu.memory_space<vmem>>, vector<1x8x100xbf16>
    %61 = vector.shape_cast %60 : vector<1x8x100xbf16> to vector<8x100xbf16>
    %c0_31 = arith.constant 0 : index
    %c0_32 = arith.constant 0 : index
    %c0_33 = arith.constant 0 : index
    %62 = vector.load %arg11[%c0_31, %c0_32, %c0_33] : memref<2x1x100xf32, #tpu.memory_space<vmem>>, vector<1x1x100xf32>
    %63 = vector.shape_cast %62 : vector<1x1x100xf32> to vector<1x100xf32>
    %c0_34 = arith.constant 0 : index
    %c0_35 = arith.constant 0 : index
    %c0_36 = arith.constant 0 : index
    %64 = vector.load %arg12[%c0_34, %c0_35, %c0_36] : memref<2x100x8xbf16, #tpu.memory_space<vmem>>, vector<1x100x8xbf16>
    %65 = vector.shape_cast %64 : vector<1x100x8xbf16> to vector<100x8xbf16>
    %c0_37 = arith.constant 0 : index
    %c0_38 = arith.constant 0 : index
    %c0_39 = arith.constant 0 : index
    %66 = vector.load %arg13[%c0_37, %c0_38, %c0_39] : memref<2x1x8xf32, #tpu.memory_space<vmem>>, vector<1x1x8xf32>
    %67 = vector.shape_cast %66 : vector<1x1x8xf32> to vector<1x8xf32>
    %c0_40 = arith.constant 0 : index
    %c0_41 = arith.constant 0 : index
    %c0_42 = arith.constant 0 : index
    %68 = vector.load %arg14[%c0_40, %c0_41, %c0_42] : memref<2x100x8xbf16, #tpu.memory_space<vmem>>, vector<1x100x8xbf16>
    %69 = vector.shape_cast %68 : vector<1x100x8xbf16> to vector<100x8xbf16>
    %c0_43 = arith.constant 0 : index
    %c0_44 = arith.constant 0 : index
    %c0_45 = arith.constant 0 : index
    %70 = vector.load %arg15[%c0_43, %c0_44, %c0_45] : memref<2x1x8xf32, #tpu.memory_space<vmem>>, vector<1x1x8xf32>
    %71 = vector.shape_cast %70 : vector<1x1x8xf32> to vector<1x8xf32>
    %72 = arith.mulf %39, %58 : vector<12x8xf32>
    %73 = arith.truncf %72 : vector<12x8xf32> to vector<12x8xbf16>
    %cst_46 = arith.constant dense<0.000000e+00> : vector<12x100xf32>
    %74 = tpu.matmul %73, %61, %cst_46 {dimension_numbers = #tpu.dot_dimension_numbers<[1], [0], [0], [1], [0, 0, 1, 1], [], []>} : vector<12x8xbf16>, vector<8x100xbf16>, vector<12x100xf32> -> vector<12x100xf32>
    %75 = vector.broadcast %63 : vector<1x100xf32> to vector<12x100xf32>
    %76 = arith.addf %74, %75 : vector<12x100xf32>
    %77 = math.tanh %76 : vector<12x100xf32>
    %78 = arith.truncf %77 : vector<12x100xf32> to vector<12x100xbf16>
    %cst_47 = arith.constant dense<0.000000e+00> : vector<12x8xf32>
    %79 = tpu.matmul %78, %65, %cst_47 {dimension_numbers = #tpu.dot_dimension_numbers<[1], [0], [0], [1], [0, 0, 1, 1], [], []>} : vector<12x100xbf16>, vector<100x8xbf16>, vector<12x8xf32> -> vector<12x8xf32>
    %80 = vector.broadcast %67 : vector<1x8xf32> to vector<12x8xf32>
    %81 = arith.addf %79, %80 : vector<12x8xf32>
    %cst_48 = arith.constant dense<0.000000e+00> : vector<12x8xf32>
    %82 = tpu.matmul %78, %69, %cst_48 {dimension_numbers = #tpu.dot_dimension_numbers<[1], [0], [0], [1], [0, 0, 1, 1], [], []>} : vector<12x100xbf16>, vector<100x8xbf16>, vector<12x8xf32> -> vector<12x8xf32>
    %83 = vector.broadcast %71 : vector<1x8xf32> to vector<12x8xf32>
    %84 = arith.addf %82, %83 : vector<12x8xf32>
    %cst_49 = arith.constant 5.000000e+00 : f32
    %85 = vector.broadcast %cst_49 : f32 to vector<12x8xf32>
    %86 = arith.addf %84, %85 : vector<12x8xf32>
    %87 = arith.negf %86 : vector<12x8xf32>
    %88 = math.exp %87 : vector<12x8xf32>
    %cst_50 = arith.constant 1.000000e+00 : f32
    %89 = vector.broadcast %cst_50 : f32 to vector<12x8xf32>
    %90 = arith.addf %89, %88 : vector<12x8xf32>
    %91 = arith.divf %89, %90 : vector<12x8xf32>
    %cst_51 = arith.constant 1.000000e+00 : f32
    %92 = vector.broadcast %cst_51 : f32 to vector<12x8xf32>
    %93 = arith.subf %92, %58 : vector<12x8xf32>
    %94 = arith.mulf %39, %91 : vector<12x8xf32>
    %95 = arith.addf %94, %81 : vector<12x8xf32>
    %96 = arith.mulf %95, %93 : vector<12x8xf32>
    %97 = arith.addf %72, %96 : vector<12x8xf32>
    %98 = math.log %91 : vector<12x8xf32>
    %99 = arith.mulf %93, %98 : vector<12x8xf32>
    %cst_52 = arith.constant dense<0.000000e+00> : vector<12xf32>
    %100 = vector.multi_reduction <add>, %99, %cst_52 [1] : vector<12x8xf32> to vector<12xf32>
    %101 = vector.shape_cast %100 : vector<12xf32> to vector<12x1xf32>
    %cst_53 = arith.constant 1.000000e+00 : f32
    %102 = vector.broadcast %cst_53 : f32 to vector<12x8xf32>
    %103 = arith.subf %102, %58 : vector<12x8xf32>
    %104 = arith.mulf %97, %103 : vector<12x8xf32>
    %105 = arith.truncf %104 : vector<12x8xf32> to vector<12x8xbf16>
    %cst_54 = arith.constant dense<0.000000e+00> : vector<12x100xf32>
    %106 = tpu.matmul %105, %61, %cst_54 {dimension_numbers = #tpu.dot_dimension_numbers<[1], [0], [0], [1], [0, 0, 1, 1], [], []>} : vector<12x8xbf16>, vector<8x100xbf16>, vector<12x100xf32> -> vector<12x100xf32>
    %107 = vector.broadcast %63 : vector<1x100xf32> to vector<12x100xf32>
    %108 = arith.addf %106, %107 : vector<12x100xf32>
    %109 = math.tanh %108 : vector<12x100xf32>
    %110 = arith.truncf %109 : vector<12x100xf32> to vector<12x100xbf16>
    %cst_55 = arith.constant dense<0.000000e+00> : vector<12x8xf32>
    %111 = tpu.matmul %110, %65, %cst_55 {dimension_numbers = #tpu.dot_dimension_numbers<[1], [0], [0], [1], [0, 0, 1, 1], [], []>} : vector<12x100xbf16>, vector<100x8xbf16>, vector<12x8xf32> -> vector<12x8xf32>
    %112 = vector.broadcast %67 : vector<1x8xf32> to vector<12x8xf32>
    %113 = arith.addf %111, %112 : vector<12x8xf32>
    %cst_56 = arith.constant dense<0.000000e+00> : vector<12x8xf32>
    %114 = tpu.matmul %110, %69, %cst_56 {dimension_numbers = #tpu.dot_dimension_numbers<[1], [0], [0], [1], [0, 0, 1, 1], [], []>} : vector<12x100xbf16>, vector<100x8xbf16>, vector<12x8xf32> -> vector<12x8xf32>
    %115 = vector.broadcast %71 : vector<1x8xf32> to vector<12x8xf32>
    %116 = arith.addf %114, %115 : vector<12x8xf32>
    %cst_57 = arith.constant 5.000000e+00 : f32
    %117 = vector.broadcast %cst_57 : f32 to vector<12x8xf32>
    %118 = arith.addf %116, %117 : vector<12x8xf32>
    %119 = arith.negf %118 : vector<12x8xf32>
    %120 = math.exp %119 : vector<12x8xf32>
    %cst_58 = arith.constant 1.000000e+00 : f32
    %121 = vector.broadcast %cst_58 : f32 to vector<12x8xf32>
    %122 = arith.addf %121, %120 : vector<12x8xf32>
    %123 = arith.divf %121, %122 : vector<12x8xf32>
    %cst_59 = arith.constant 1.000000e+00 : f32
    %124 = vector.broadcast %cst_59 : f32 to vector<12x8xf32>
    %125 = arith.subf %124, %103 : vector<12x8xf32>
    %126 = arith.mulf %97, %123 : vector<12x8xf32>
    %127 = arith.addf %126, %113 : vector<12x8xf32>
    %128 = arith.mulf %127, %125 : vector<12x8xf32>
    %129 = arith.addf %104, %128 : vector<12x8xf32>
    %130 = math.log %123 : vector<12x8xf32>
    %131 = arith.mulf %125, %130 : vector<12x8xf32>
    %cst_60 = arith.constant dense<0.000000e+00> : vector<12xf32>
    %132 = vector.multi_reduction <add>, %131, %cst_60 [1] : vector<12x8xf32> to vector<12xf32>
    %133 = vector.shape_cast %132 : vector<12xf32> to vector<12x1xf32>
    %134 = arith.addf %59, %101 : vector<12x1xf32>
    %135 = arith.addf %134, %133 : vector<12x1xf32>
    %c1 = arith.constant 1 : index
    %c0_61 = arith.constant 0 : index
    %c0_62 = arith.constant 0 : index
    %136 = vector.load %arg10[%c1, %c0_61, %c0_62] : memref<2x8x100xbf16, #tpu.memory_space<vmem>>, vector<1x8x100xbf16>
    %137 = vector.shape_cast %136 : vector<1x8x100xbf16> to vector<8x100xbf16>
    %c1_63 = arith.constant 1 : index
    %c0_64 = arith.constant 0 : index
    %c0_65 = arith.constant 0 : index
    %138 = vector.load %arg11[%c1_63, %c0_64, %c0_65] : memref<2x1x100xf32, #tpu.memory_space<vmem>>, vector<1x1x100xf32>
    %139 = vector.shape_cast %138 : vector<1x1x100xf32> to vector<1x100xf32>
    %c1_66 = arith.constant 1 : index
    %c0_67 = arith.constant 0 : index
    %c0_68 = arith.constant 0 : index
    %140 = vector.load %arg12[%c1_66, %c0_67, %c0_68] : memref<2x100x8xbf16, #tpu.memory_space<vmem>>, vector<1x100x8xbf16>
    %141 = vector.shape_cast %140 : vector<1x100x8xbf16> to vector<100x8xbf16>
    %c1_69 = arith.constant 1 : index
    %c0_70 = arith.constant 0 : index
    %c0_71 = arith.constant 0 : index
    %142 = vector.load %arg13[%c1_69, %c0_70, %c0_71] : memref<2x1x8xf32, #tpu.memory_space<vmem>>, vector<1x1x8xf32>
    %143 = vector.shape_cast %142 : vector<1x1x8xf32> to vector<1x8xf32>
    %c1_72 = arith.constant 1 : index
    %c0_73 = arith.constant 0 : index
    %c0_74 = arith.constant 0 : index
    %144 = vector.load %arg14[%c1_72, %c0_73, %c0_74] : memref<2x100x8xbf16, #tpu.memory_space<vmem>>, vector<1x100x8xbf16>
    %145 = vector.shape_cast %144 : vector<1x100x8xbf16> to vector<100x8xbf16>
    %c1_75 = arith.constant 1 : index
    %c0_76 = arith.constant 0 : index
    %c0_77 = arith.constant 0 : index
    %146 = vector.load %arg15[%c1_75, %c0_76, %c0_77] : memref<2x1x8xf32, #tpu.memory_space<vmem>>, vector<1x1x8xf32>
    %147 = vector.shape_cast %146 : vector<1x1x8xf32> to vector<1x8xf32>
    %148 = arith.mulf %129, %58 : vector<12x8xf32>
    %149 = arith.truncf %148 : vector<12x8xf32> to vector<12x8xbf16>
    %cst_78 = arith.constant dense<0.000000e+00> : vector<12x100xf32>
    %150 = tpu.matmul %149, %137, %cst_78 {dimension_numbers = #tpu.dot_dimension_numbers<[1], [0], [0], [1], [0, 0, 1, 1], [], []>} : vector<12x8xbf16>, vector<8x100xbf16>, vector<12x100xf32> -> vector<12x100xf32>
    %151 = vector.broadcast %139 : vector<1x100xf32> to vector<12x100xf32>
    %152 = arith.addf %150, %151 : vector<12x100xf32>
    %153 = math.tanh %152 : vector<12x100xf32>
    %154 = arith.truncf %153 : vector<12x100xf32> to vector<12x100xbf16>
    %cst_79 = arith.constant dense<0.000000e+00> : vector<12x8xf32>
    %155 = tpu.matmul %154, %141, %cst_79 {dimension_numbers = #tpu.dot_dimension_numbers<[1], [0], [0], [1], [0, 0, 1, 1], [], []>} : vector<12x100xbf16>, vector<100x8xbf16>, vector<12x8xf32> -> vector<12x8xf32>
    %156 = vector.broadcast %143 : vector<1x8xf32> to vector<12x8xf32>
    %157 = arith.addf %155, %156 : vector<12x8xf32>
    %cst_80 = arith.constant dense<0.000000e+00> : vector<12x8xf32>
    %158 = tpu.matmul %154, %145, %cst_80 {dimension_numbers = #tpu.dot_dimension_numbers<[1], [0], [0], [1], [0, 0, 1, 1], [], []>} : vector<12x100xbf16>, vector<100x8xbf16>, vector<12x8xf32> -> vector<12x8xf32>
    %159 = vector.broadcast %147 : vector<1x8xf32> to vector<12x8xf32>
    %160 = arith.addf %158, %159 : vector<12x8xf32>
    %cst_81 = arith.constant 5.000000e+00 : f32
    %161 = vector.broadcast %cst_81 : f32 to vector<12x8xf32>
    %162 = arith.addf %160, %161 : vector<12x8xf32>
    %163 = arith.negf %162 : vector<12x8xf32>
    %164 = math.exp %163 : vector<12x8xf32>
    %cst_82 = arith.constant 1.000000e+00 : f32
    %165 = vector.broadcast %cst_82 : f32 to vector<12x8xf32>
    %166 = arith.addf %165, %164 : vector<12x8xf32>
    %167 = arith.divf %165, %166 : vector<12x8xf32>
    %cst_83 = arith.constant 1.000000e+00 : f32
    %168 = vector.broadcast %cst_83 : f32 to vector<12x8xf32>
    %169 = arith.subf %168, %58 : vector<12x8xf32>
    %170 = arith.mulf %129, %167 : vector<12x8xf32>
    %171 = arith.addf %170, %157 : vector<12x8xf32>
    %172 = arith.mulf %171, %169 : vector<12x8xf32>
    %173 = arith.addf %148, %172 : vector<12x8xf32>
    %174 = math.log %167 : vector<12x8xf32>
    %175 = arith.mulf %169, %174 : vector<12x8xf32>
    %cst_84 = arith.constant dense<0.000000e+00> : vector<12xf32>
    %176 = vector.multi_reduction <add>, %175, %cst_84 [1] : vector<12x8xf32> to vector<12xf32>
    %177 = vector.shape_cast %176 : vector<12xf32> to vector<12x1xf32>
    %cst_85 = arith.constant 1.000000e+00 : f32
    %178 = vector.broadcast %cst_85 : f32 to vector<12x8xf32>
    %179 = arith.subf %178, %58 : vector<12x8xf32>
    %180 = arith.mulf %173, %179 : vector<12x8xf32>
    %181 = arith.truncf %180 : vector<12x8xf32> to vector<12x8xbf16>
    %cst_86 = arith.constant dense<0.000000e+00> : vector<12x100xf32>
    %182 = tpu.matmul %181, %137, %cst_86 {dimension_numbers = #tpu.dot_dimension_numbers<[1], [0], [0], [1], [0, 0, 1, 1], [], []>} : vector<12x8xbf16>, vector<8x100xbf16>, vector<12x100xf32> -> vector<12x100xf32>
    %183 = vector.broadcast %139 : vector<1x100xf32> to vector<12x100xf32>
    %184 = arith.addf %182, %183 : vector<12x100xf32>
    %185 = math.tanh %184 : vector<12x100xf32>
    %186 = arith.truncf %185 : vector<12x100xf32> to vector<12x100xbf16>
    %cst_87 = arith.constant dense<0.000000e+00> : vector<12x8xf32>
    %187 = tpu.matmul %186, %141, %cst_87 {dimension_numbers = #tpu.dot_dimension_numbers<[1], [0], [0], [1], [0, 0, 1, 1], [], []>} : vector<12x100xbf16>, vector<100x8xbf16>, vector<12x8xf32> -> vector<12x8xf32>
    %188 = vector.broadcast %143 : vector<1x8xf32> to vector<12x8xf32>
    %189 = arith.addf %187, %188 : vector<12x8xf32>
    %cst_88 = arith.constant dense<0.000000e+00> : vector<12x8xf32>
    %190 = tpu.matmul %186, %145, %cst_88 {dimension_numbers = #tpu.dot_dimension_numbers<[1], [0], [0], [1], [0, 0, 1, 1], [], []>} : vector<12x100xbf16>, vector<100x8xbf16>, vector<12x8xf32> -> vector<12x8xf32>
    %191 = vector.broadcast %147 : vector<1x8xf32> to vector<12x8xf32>
    %192 = arith.addf %190, %191 : vector<12x8xf32>
    %cst_89 = arith.constant 5.000000e+00 : f32
    %193 = vector.broadcast %cst_89 : f32 to vector<12x8xf32>
    %194 = arith.addf %192, %193 : vector<12x8xf32>
    %195 = arith.negf %194 : vector<12x8xf32>
    %196 = math.exp %195 : vector<12x8xf32>
    %cst_90 = arith.constant 1.000000e+00 : f32
    %197 = vector.broadcast %cst_90 : f32 to vector<12x8xf32>
    %198 = arith.addf %197, %196 : vector<12x8xf32>
    %199 = arith.divf %197, %198 : vector<12x8xf32>
    %cst_91 = arith.constant 1.000000e+00 : f32
    %200 = vector.broadcast %cst_91 : f32 to vector<12x8xf32>
    %201 = arith.subf %200, %179 : vector<12x8xf32>
    %202 = arith.mulf %173, %199 : vector<12x8xf32>
    %203 = arith.addf %202, %189 : vector<12x8xf32>
    %204 = arith.mulf %203, %201 : vector<12x8xf32>
    %205 = arith.addf %180, %204 : vector<12x8xf32>
    %206 = math.log %199 : vector<12x8xf32>
    %207 = arith.mulf %201, %206 : vector<12x8xf32>
    %cst_92 = arith.constant dense<0.000000e+00> : vector<12xf32>
    %208 = vector.multi_reduction <add>, %207, %cst_92 [1] : vector<12x8xf32> to vector<12xf32>
    %209 = vector.shape_cast %208 : vector<12xf32> to vector<12x1xf32>
    %210 = arith.addf %135, %177 : vector<12x1xf32>
    %211 = arith.addf %210, %209 : vector<12x1xf32>
    %c0_93 = arith.constant 0 : index
    %c0_94 = arith.constant 0 : index
    %212 = vector.load %arg16[%c0_93, %c0_94] : memref<12x8xf32, #tpu.memory_space<vmem>>, vector<12x8xf32>
    tpu.vector_store %arg16[%c0_93, %c0_94], %205 {strides = array<i32>} : memref<12x8xf32, #tpu.memory_space<vmem>>, vector<12x8xf32>,
    %213 = arith.subf %53, %211 : vector<12x1xf32>
    %c0_95 = arith.constant 0 : index
    %c0_96 = arith.constant 0 : index
    %214 = vector.load %arg17[%c0_95, %c0_96] : memref<12x1xf32, #tpu.memory_space<vmem>>, vector<12x1xf32>
    tpu.vector_store %arg17[%c0_95, %c0_96], %213 {strides = array<i32>} : memref<12x1xf32, #tpu.memory_space<vmem>>, vector<12x1xf32>,
    return
  }
}

</mosaic_0001>

<bundles_post_ra>
// kernel: tpu_custom_call.1
= control target key start
LH: loop header
LB: loop body
LE: loop exit
PB: predicated region body
PF: predicated region fallthrough
CT: control target
= control target key end

     0   :  { %vm76_vm0 = vcmask 130048   ;;  %vm270_vm1 = vcmask 1043456   ;;  %vm266_vm2 = vcmask 588800   ;;  %vm638_vm3 = vcmask 64512   ;;  %s2593_s2 = inlined_call_operand.vmem [shape: bf16[16,200], index: 2, kind: input, shape index: {}]   ;;  %s2594_s0 = inlined_call_operand.vmem [shape: f32[4,16], index: 0, kind: input, shape index: {}]   ;;  %s2595_s4 = inlined_call_operand.vmem [shape: bf16[200,200], index: 4, kind: input, shape index: {}]   ;;  %s2596_s6 = inlined_call_operand.vmem [shape: bf16[200,8], index: 6, kind: input, shape index: {}]   ;;  %s2597_s8 = inlined_call_operand.vmem [shape: bf16[200,8], index: 8, kind: input, shape index: {}]   ;;  %s2598_s3 = inlined_call_operand.vmem [shape: f32[1,200], index: 3, kind: input, shape index: {}]   ;;  %s2599_s5 = inlined_call_operand.vmem [shape: f32[1,200], index: 5, kind: input, shape index: {}]   ;;  %s2600_s7 = inlined_call_operand.vmem [shape: f32[1,8], index: 7, kind: input, shape index: {}]   ;;  %s2601_s9 = inlined_call_operand.vmem [shape: f32[1,8], index: 9, kind: input, shape index: {}]   ;;  %s2602_s1 = inlined_call_operand.vmem [shape: f32[12,8], index: 1, kind: input, shape index: {}]   ;;  %s2603_s11 = inlined_call_operand.vmem [shape: f32[2,1,100], index: 11, kind: input, shape index: {}]   ;;  %s2604_s10 = inlined_call_operand.vmem [shape: bf16[2,8,100], index: 10, kind: input, shape index: {}]   ;;  %s2605_s15 = inlined_call_operand.vmem [shape: f32[2,1,8], index: 15, kind: input, shape index: {}]   ;;  %s2606_s12 = inlined_call_operand.vmem [shape: bf16[2,100,8], index: 12, kind: input, shape index: {}]   ;;  %s2607_s14 = inlined_call_operand.vmem [shape: bf16[2,100,8], index: 14, kind: input, shape index: {}]   ;;  %s2608_s13 = inlined_call_operand.vmem [shape: f32[2,1,8], index: 13, kind: input, shape index: {}]   ;;  %s2609_s16 = inlined_call_operand.vmem [shape: f32[12,8], index: 16, kind: output, shape index: {0}]   ;;  %s2610_s17 = inlined_call_operand.vmem [shape: f32[12,1], index: 17, kind: output, shape index: {1}]  }
   0x1   :  { %2612 = sst [smem:[#allocation2_spill]] %s2593_s2  ;;  %v1513_v6 = vld [vmem:[%s2595_s4 + $0x70] sm:$0xf]  ;;  %v1815_v9 = vld [vmem:[%s2595_s4 + $0x74] sm:$0xf0]  ;;  %v134_v24 = vld [vmem:[%s2595_s4 + $0xc0] sm:$0xff] }
   0x2   :  { %2613 = sst [smem:[#allocation3_spill]] %s2594_s0  ;;  %v1814_v10 = vld [vmem:[%s2595_s4 + $0x74] sm:$0xf]  ;;  %v1515_v11 = vld [vmem:[%s2595_s4 + $0x78] sm:$0xf0]  ;;  %v1514_v12 = vor.u32 %v1815_v9, %v1513_v6  ;;  %v214_v25 = vunpack.c.l.b16 %v134_v24  ;;  %v215_v26 = vunpack.c.h.b16 %v134_v24  ;;  %vm631_vm4 = vcmask 60416  }
   0x3   :  { %s2614_s26 = sld [smem:[#allocation2_spill]]  ;;  %v1518_v13 = vor.u32 %v1814_v10, %v1515_v11  ;;  %v1505_v14 = vld [vmem:[%s2595_s4 + $0x60] sm:$0xf]  ;;  %v1813_v15 = vld [vmem:[%s2595_s4 + $0x64] sm:$0xf0]  ;;  %v1843_v24 = vld [vmem:[%s2597_s8 + $0x38] sm:$0xff] }
   0x4   :  { %s2615_s20 = sld [smem:[#allocation3_spill]]  ;;  %v1812_v16 = vld [vmem:[%s2595_s4 + $0x64] sm:$0xf]  ;;  %v1507_v17 = vld [vmem:[%s2595_s4 + $0x68] sm:$0xf0]  ;;  %277 = vmatpush.bf16.msra.mxu2 %v1514_v12  ;;  %v1506_v18 = vor.u32 %v1813_v15, %v1505_v14  ;;  %v240_v31 = vpack.c.b16 %v214_v25, %v214_v25  ;;  %v241_v32 = vpack.c.b16 %v215_v26, %v215_v26  ;;  %v1830_v26 = vld [vmem:[%s2596_s6 + $0x30] sm:$0xff] }
   0x5   :  { %v1510_v19 = vor.u32 %v1812_v16, %v1507_v17  ;;  %v1497_v20 = vld [vmem:[%s2595_s4 + $0x50] sm:$0xf]  ;;  %v1811_v21 = vld [vmem:[%s2595_s4 + $0x54] sm:$0xf0]  ;;  %v1810_v22 = vld [vmem:[%s2595_s4 + $0x54] sm:$0xf] }
   0x6   :  { %v1499_v23 = vld [vmem:[%s2595_s4 + $0x58] sm:$0xf0]  ;;  %v1498_v27 = vor.u32 %v1811_v21, %v1497_v20  ;;  %v1489_v28 = vld [vmem:[%s2595_s4 + $0x40] sm:$0xf]  ;;  %v1545_v29 = vld [vmem:[%s2595_s4 + $0xb0] sm:$0xf] }
   0x7   :  { %v1502_v30 = vor.u32 %v1810_v22, %v1499_v23  ;;  %v1823_v33 = vld [vmem:[%s2595_s4 + $0xb4] sm:$0xf0]  ;;  %v1822_v34 = vld [vmem:[%s2595_s4 + $0xb4] sm:$0xf]  ;;  %v1547_v35 = vld [vmem:[%s2595_s4 + $0xb8] sm:$0xf0] }
   0x8   :  { %278 = vmatpush.bf16.msra.mxu2 %v1506_v18  ;;  %v1809_v36 = vld [vmem:[%s2595_s4 + $0x44] sm:$0xf0]  ;;  %v1808_v37 = vld [vmem:[%s2595_s4 + $0x44] sm:$0xf]  ;;  %v1491_v38 = vld [vmem:[%s2595_s4 + $0x48] sm:$0xf0]  ;;  %v1546_v41 = vor.u32 %v1823_v33, %v1545_v29  ;;  %v1550_v42 = vor.u32 %v1822_v34, %v1547_v35 }
   0x9   :  { %v1447_v0 = vld [vmem:[%s2614_s26] sm:$0xf]  ;;  %v1799_v1 = vld [vmem:[%s2614_s26 + $0x4] sm:$0xf0]  ;;  %v1798_v2 = vld [vmem:[%s2614_s26 + $0x4] sm:$0xf]  ;;  %v1490_v43 = vor.u32 %v1809_v36, %v1489_v28  ;;  %v1494_v44 = vor.u32 %v1808_v37, %v1491_v38 }
   0xa   :  { %v1448_v3 = vor.u32 %v1799_v1, %v1447_v0  ;;  %v1449_v4 = vld [vmem:[%s2614_s26 + $0x8] sm:$0xf0]  ;;  %v56_v5 = vld [vmem:[%s2615_s20] sm:$0xf]  ;;  %v272_v39 = vsel %vm270_vm1, %v240_v31, 0  ;;  %v275_v40 = vsel %vm270_vm1, %v241_v32, 0 }
   0xb   :  { %v1452_v7 = vor.u32 %v1798_v2, %v1449_v4  ;;  %v57_v8 = vpack.c.bf16 %v56_v5, %v56_v5  ;;  %293 = vmatpush.bf16.msra.mxu3 %v272_v39  ;;  %v1481_v45 = vld [vmem:[%s2595_s4 + $0x30] sm:$0xf]  ;;  %v1807_v46 = vld [vmem:[%s2595_s4 + $0x34] sm:$0xf0]  ;;  %v1806_v47 = vld [vmem:[%s2595_s4 + $0x34] sm:$0xf] }
   0xc   :  { %87 = vmatpush.bf16.msra.mxu0 %v1448_v3  ;;  %279 = vmatpush.bf16.msra.mxu2 %v1498_v27  ;;  %v1483_v48 = vld [vmem:[%s2595_s4 + $0x38] sm:$0xf0]  ;;  %v1482_v49 = vor.u32 %v1807_v46, %v1481_v45  ;;  %v1473_v51 = vld [vmem:[%s2595_s4 + $0x20] sm:$0xf]  ;;  %v1805_v52 = vld [vmem:[%s2595_s4 + $0x24] sm:$0xf0] }
   0xd   :  { %100 = vmatpush.bf16.msra.mxu1 %v1452_v7  ;;  %v1486_v50 = vor.u32 %v1806_v47, %v1483_v48  ;;  %v1537_v53 = vld [vmem:[%s2595_s4 + $0xa0] sm:$0xf]  ;;  %v1474_v54 = vor.u32 %v1805_v52, %v1473_v51  ;;  %v1821_v55 = vld [vmem:[%s2595_s4 + $0xa4] sm:$0xf0]  ;;  %v1804_v56 = vld [vmem:[%s2595_s4 + $0x24] sm:$0xf] }
   0xe   :  { %v1538_v57 = vor.u32 %v1821_v55, %v1537_v53  ;;  %v1475_v58 = vld [vmem:[%s2595_s4 + $0x28] sm:$0xf0]  ;;  %v1820_v59 = vld [vmem:[%s2595_s4 + $0xa4] sm:$0xf]  ;;  %v1465_v63 = vld [vmem:[%s2595_s4 + $0x10] sm:$0xf] }
   0xf   :  { %1453 = vmatmul.msk.bf16.vlgmr.msra.gmra.mxu0 %vm76_vm0, %v57_v8  ;;  %294 = vmatpush.bf16.msra.mxu3 %v1546_v41  ;;  %v1539_v60 = vld [vmem:[%s2595_s4 + $0xa8] sm:$0xf0]  ;;  %v1478_v61 = vor.u32 %v1804_v56, %v1475_v58  ;;  %v1803_v0 = vld [vmem:[%s2595_s4 + $0x14] sm:$0xf0]  ;;  %v1529_v1 = vld [vmem:[%s2595_s4 + $0x90] sm:$0xf] }
  0x10   :  { %303 = vmatpush.bf16.msrb.mxu0 %v1518_v13  ;;  %1454 = vmatmul.msk.bf16.vlgmr.msra.gmra.mxu1 %vm76_vm0, %v57_v8  ;;  %v1542_v62 = vor.u32 %v1820_v59, %v1539_v60  ;;  %v1466_v2 = vor.u32 %v1803_v0, %v1465_v63  ;;  %v1819_v3 = vld [vmem:[%s2595_s4 + $0x94] sm:$0xf0]  ;;  %v1802_v4 = vld [vmem:[%s2595_s4 + $0x14] sm:$0xf]  ;;  %v1467_v5 = vld [vmem:[%s2595_s4 + $0x18] sm:$0xf0] }
  0x11   :  { %319 = vmatpush.bf16.msrb.mxu1 %v275_v40  ;;  %280 = vmatpush.bf16.msra.mxu2 %v1490_v43  ;;  %v1530_v6 = vor.u32 %v1819_v3, %v1529_v1  ;;  %v1470_v7 = vor.u32 %v1802_v4, %v1467_v5  ;;  %v1818_v8 = vld [vmem:[%s2595_s4 + $0x94] sm:$0xf]  ;;  %v1531_v9 = vld [vmem:[%s2595_s4 + $0x98] sm:$0xf0]  ;;  %v1457_v11 = vld [vmem:[%s2595_s4] sm:$0xf] }
  0x12   :  { %v1534_v10 = vor.u32 %v1818_v8, %v1531_v9  ;;  %v1801_v12 = vld [vmem:[%s2595_s4 + $0x4] sm:$0xf0]  ;;  %v1521_v13 = vld [vmem:[%s2595_s4 + $0x80] sm:$0xf]  ;;  %v1800_v16 = vld [vmem:[%s2595_s4 + $0x4] sm:$0xf] }
  0x13   :  { %295 = vmatpush.bf16.msra.mxu3 %v1538_v57  ;;  %v1458_v14 = vor.u32 %v1801_v12, %v1457_v11  ;;  %v1817_v15 = vld [vmem:[%s2595_s4 + $0x84] sm:$0xf0]  ;;  %v1459_v17 = vld [vmem:[%s2595_s4 + $0x8] sm:$0xf0]  ;;  %v1816_v20 = vld [vmem:[%s2595_s4 + $0x84] sm:$0xf] }
  0x14   :  { %304 = vmatpush.bf16.msrb.mxu0 %v1510_v19  ;;  %v1522_v18 = vor.u32 %v1817_v15, %v1521_v13  ;;  %v1462_v19 = vor.u32 %v1800_v16, %v1459_v17  ;;  %v1523_v21 = vld [vmem:[%s2595_s4 + $0x88] sm:$0xf0]  ;;  %v1831_v23 = vld [vmem:[%s2596_s6 + $0x38] sm:$0xff]  ;;  %v357_v25 = vld [vmem:[%s2596_s6 + $0x60] sm:$0xf]  ;;  %vm778_vm6 = vcmask 1041408  }
  0x15   :  { %320 = vmatpush.bf16.msrb.mxu1 %v1550_v42  ;;  %281 = vmatpush.bf16.msra.mxu2 %v1482_v49  ;;  %v1526_v22 = vor.u32 %v1816_v20, %v1523_v21  ;;  %v1842_v27 = vld [vmem:[%s2597_s8 + $0x30] sm:$0xff]  ;;  %v411_v28 = vunpack.c.l.b16 %v357_v25  ;;  %v1829_v31 = vld [vmem:[%s2596_s6 + $0x28] sm:$0xff]  ;;  %v1835_v33 = vld [vmem:[%s2596_s6 + $0x58] sm:$0xff]  ;;  %vm774_vm7 = vcmask 818176  }
  0x16   :  { %v1841_v32 = vld [vmem:[%s2597_s8 + $0x28] sm:$0xff]  ;;  %v60_v34 = vld [vmem:[%s2598_s3] sm:$0x3]  ;;  %v1834_v49 = vld [vmem:[%s2596_s6 + $0x50] sm:$0xff] }
  0x17   :  { %296 = vmatpush.bf16.msra.mxu3 %v1530_v6  ;;  %v424_v29 = vpack.c.b16 %v411_v28, %v411_v28  ;;  %v62_v35 = vperm.slane %v60_v34, 0  ;;  %v63_v36 = vperm.slane %v60_v34, 1  ;;  %v1828_v47 = vld [vmem:[%s2596_s6 + $0x20] sm:$0xff]  ;;  %v1839_v51 = vld [vmem:[%s2597_s8 + $0x18] sm:$0xff]  ;;  %v1833_v52 = vld [vmem:[%s2596_s6 + $0x48] sm:$0xff] }
  0x18   :  { %305 = vmatpush.bf16.msrb.mxu0 %v1502_v30  ;;  %v1840_v48 = vld [vmem:[%s2597_s8 + $0x20] sm:$0xff]  ;;  %v1826_v53 = vld [vmem:[%s2596_s6 + $0x10] sm:$0xff]  ;;  %v1825_v56 = vld [vmem:[%s2596_s6 + $0x8] sm:$0xff] }
  0x19   :  { %282 = vmatpush.bf16.msra.mxu2 %v1474_v54  ;;  %321 = vmatpush.bf16.msrb.mxu1 %v1542_v62  ;;  %v441_v30 = vsel %vm270_vm1, %v424_v29, 0  ;;  %v1838_v54 = vld [vmem:[%s2597_s8 + $0x10] sm:$0xff]  ;;  %v1832_v55 = vld [vmem:[%s2596_s6 + $0x40] sm:$0xff]  ;;  %v1837_v57 = vld [vmem:[%s2597_s8 + $0x8] sm:$0xff] }
  0x1a   :  { %v493_v58 = vld [vmem:[%s2597_s8 + $0x60] sm:$0xf]  ;;  %v1847_v0 = vld [vmem:[%s2597_s8 + $0x58] sm:$0xff]  ;;  %v1846_v1 = vld [vmem:[%s2597_s8 + $0x50] sm:$0xff] }
  0x1b   :  { %297 = vmatpush.bf16.msra.mxu3 %v1522_v18  ;;  %v547_v59 = vunpack.c.l.b16 %v493_v58  ;;  %v1824_v60 = vld [vmem:[%s2596_s6] sm:$0xff]  ;;  %v1845_v3 = vld [vmem:[%s2597_s8 + $0x48] sm:$0xff] }
  0x1c   :  { %306 = vmatpush.bf16.msrb.mxu0 %v1494_v44  ;;  %v1836_v62 = vld [vmem:[%s2597_s8] sm:$0xff] }
  0x1d   :  { %283 = vmatpush.bf16.msra.mxu2 %v1466_v2  ;;  %322 = vmatpush.bf16.msrb.mxu1 %v1534_v10  ;;  %v135_v2 = vld [vmem:[%s2599_s5] sm:$0x3] }
  0x1e   :  { %v138_v4 = vperm.slane %v135_v2, 1  ;;  %v1844_v5 = vld [vmem:[%s2597_s8 + $0x40] sm:$0xff]  ;;  %v137_v10 = vperm.slane %v135_v2, 0 }
  0x1f   :  { %443 = vmatpush.bf16.msrb.mxu3 %v1831_v23  ;;  %v605_v23 = vld [vmem:[%s2602_s1] sm:$0xff] }
  0x20   :  { %307 = vmatpush.bf16.msrb.mxu0 %v1486_v50  ;;  %v1827_v50 = vld [vmem:[%s2596_s6 + $0x18] sm:$0xff] }
  0x21   :  { %284 = vmatpush.bf16.msra.mxu2 %v1458_v14  ;;  %323 = vmatpush.bf16.msrb.mxu1 %v1526_v22 }
  0x23   :  { %444 = vmatpush.bf16.msrb.mxu3 %v1830_v26  ;;  %v606_v26 = vld [vmem:[%s2602_s1 + $0x8] sm:$0xf] }
  0x24   :  { %308 = vmatpush.bf16.msrb.mxu0 %v1478_v61  ;;  %v560_v61 = vpack.c.b16 %v547_v59, %v547_v59 }
  0x25   :  { %576 = vmatpush.bf16.msrb.mxu2 %v1843_v24  ;;  %459 = vmatpush.bf16.msra.mxu1 %v441_v30  ;;  %v636_v24 = vmul.f32 %v605_v23, %v605_v23 }
  0x26   :  { %v574_v63 = vsel %vm270_vm1, %v560_v61, 0 }
  0x27   :  { %445 = vmatpush.bf16.msrb.mxu3 %v1829_v31  ;;  %v639_v25 = vsel %vm638_vm3, %v636_v24, 0.0 }
  0x28   :  { %309 = vmatpush.bf16.msrb.mxu0 %v1470_v7  ;;  %640 = vadd.xlane.f32.xlu2 %v639_v25 }
  0x29   :  { %577 = vmatpush.bf16.msrb.mxu2 %v1842_v27  ;;  %460 = vmatpush.bf16.msra.mxu1 %v1835_v33  ;;  %v637_v27 = vmul.f32 %v606_v26, %v606_v26 }
  0x2b   :  { %446 = vmatpush.bf16.msrb.mxu3 %v1828_v47  ;;  %v642_v29 = vsel %vm631_vm4, %v637_v27, 0.0 }
  0x2c   :  { %310 = vmatpush.bf16.msrb.mxu0 %v1462_v19  ;;  %643 = vadd.xlane.f32.xlu0 %v642_v29 }
  0x2d   :  { %578 = vmatpush.bf16.msrb.mxu2 %v1841_v32  ;;  %461 = vmatpush.bf16.msra.mxu1 %v1834_v49 }
  0x2f   :  { %447 = vmatpush.bf16.msrb.mxu3 %v1827_v50 }
  0x31   :  { %579 = vmatpush.bf16.msrb.mxu2 %v1840_v48  ;;  %462 = vmatpush.bf16.msra.mxu1 %v1833_v52  ;;  %v668_v48 = vlaneseq }
  0x33   :  { %448 = vmatpush.bf16.msrb.mxu3 %v1826_v53  ;;  %v669_v52 = vand.u32 127, %v668_v48 }
  0x35   :  { %580 = vmatpush.bf16.msrb.mxu2 %v1839_v51  ;;  %463 = vmatpush.bf16.msra.mxu1 %v1832_v55  ;;  %vm670_vm5 = vcmp.lt.s32.totalorder %v669_v52, 4 }
  0x37   :  { %449 = vmatpush.bf16.msrb.mxu3 %v1825_v56 }
  0x39   :  { %581 = vmatpush.bf16.msrb.mxu2 %v1838_v54  ;;  %v1957_v54 = vmov 0.0  }
  0x3a   :  { %v2325_v55 = vsel %vm670_vm5, 1.0, %v1957_v54 }
  0x3b   :  { %450 = vmatpush.bf16.msrb.mxu3 %v1824_v60 }
  0x3d   :  { %582 = vmatpush.bf16.msrb.mxu2 %v1837_v57 }
  0x41   :  { %583 = vmatpush.bf16.msrb.mxu2 %v1836_v62 }
  0x8c   :  { %v89_v37 = vpop.f32.mrf.mxu0 }
  0x8d   :  { %v90_v38 = vadd.f32 %v89_v37, %v62_v35  ;;  %v102_v39 = vpop.f32.mrf.mxu1  ;;  %v1876_v35 = vld [vmem:[%s2601_s9] ss:$0 sm:$0xff] }
  0x8e   :  { %v103_v40 = vadd.f32 %v102_v39, %v63_v36  ;;  %v673_v39 = vld [vmem:[%s2604_s10] sm:$0xf] }
  0x8f   :  { %1883 = vtanh.f32 %v90_v38 }
  0x90   :  { %1885 = vtanh.f32 %v103_v40 }
  0x94   :  { %v91_v41 = vpop.f32.mrf.mxu0 }
  0x95   :  { %v1884_v42 = vpop.eup %1883  ;;  %v104_v43 = vpop.f32.mrf.mxu1 }
  0x96   :  { %v1886_v44 = vpop.eup %1885  ;;  %v108_v45 = vpack.c.bf16 %v1884_v42, %v1884_v42  ;;  %v713_v42 = vsel %vm270_vm1, %v673_v39, 0 }
  0x97   :  { %v109_v46 = vpack.c.bf16 %v1886_v44, %v1886_v44 }
  0x98   :  { %285 = vmatmul.bf16.vlgmr.msra.gmra.mxu2 %v108_v45  ;;  %311 = vmatmul.bf16.vlgmr.msrb.gmra.mxu0 %v108_v45 }
  0x99   :  { %1551 = vmatmul.msk.bf16.vlgmr.msra.gmra.mxu3 %vm266_vm2, %v109_v46  ;;  %1552 = vmatmul.msk.bf16.vlgmr.msrb.gmra.mxu1 %vm266_vm2, %v109_v46  ;;  %v1875_v46 = vld [vmem:[%s2600_s7] ss:$0 sm:$0xff] }
  0x9a   :  { %592 = vmatpush.bf16.msra.mxu3 %v574_v63  ;;  %722 = vmatpush.bf16.msrb.mxu1 %v713_v42 }
  0x9e   :  { %593 = vmatpush.bf16.msra.mxu3 %v1847_v0  ;;  %v687_v0 = vld [vmem:[%s2606_s12 + $0x30] sm:$0x3] }
  0x9f   :  { %v760_v2 = vunpack.c.l.b16 %v687_v0 }
  0xa2   :  { %594 = vmatpush.bf16.msra.mxu3 %v1846_v1  ;;  %v701_v1 = vld [vmem:[%s2607_s14 + $0x30] sm:$0x3] }
  0xa6   :  { %595 = vmatpush.bf16.msra.mxu3 %v1845_v3  ;;  %v824_v3 = vunpack.c.l.b16 %v701_v1 }
  0xaa   :  { %596 = vmatpush.bf16.msra.mxu3 %v1844_v5  ;;  %v831_v5 = vpack.c.b16 %v824_v3, %v824_v3 }
 0x115   :  { %v312_v6 = vpop.f32.mrf.mxu0 }
 0x116   :  { %v313_v7 = vadd.f32 %v312_v6, %v138_v4  ;;  %v325_v8 = vpop.f32.mrf.mxu1  ;;  %v767_v4 = vpack.c.b16 %v760_v2, %v760_v2  ;;  %v2410_v2 = vsub.f32 1.0, %v2325_v55 }
 0x118   :  { %v326_v9 = vadd.f32 %v325_v8, %v313_v7  ;;  %v780_v6 = vsel %vm778_vm6, %v767_v4, 0  ;;  %v839_v7 = vsel %vm778_vm6, %v831_v5, 0  ;;  %v1853_v8 = vld [vmem:[%s2606_s12 + $0x28] sm:$0xff] }
 0x119   :  { %842 = vmatpush.bf16.msra.mxu0 %v839_v7  ;;  %943 = vmatpush.bf16.msra.mxu2 %v780_v6 }
 0x11a   :  { %1887 = vtanh.f32 %v326_v9  ;;  %v1859_v9 = vld [vmem:[%s2607_s14 + $0x28] sm:$0xff] }
 0x11b   :  { %v286_v11 = vpop.f32.mrf.mxu2 }
 0x11c   :  { %v287_v12 = vadd.f32 %v286_v11, %v137_v10  ;;  %v299_v13 = vpop.f32.mrf.mxu3  ;;  %v1852_v10 = vld [vmem:[%s2606_s12 + $0x20] sm:$0xff] }
 0x11d   :  { %v314_v14 = vpop.f32.mrf.mxu0  ;;  %843 = vmatpush.bf16.msra.mxu0 %v1859_v9  ;;  %944 = vmatpush.bf16.msra.mxu2 %v1853_v8  ;;  %v1858_v11 = vld [vmem:[%s2607_s14 + $0x20] sm:$0xff] }
 0x11e   :  { %v300_v15 = vadd.f32 %v299_v13, %v287_v12  ;;  %v327_v16 = vpop.f32.mrf.mxu1  ;;  %v1851_v12 = vld [vmem:[%s2606_s12 + $0x18] sm:$0xff]  ;;  %v1850_v14 = vld [vmem:[%s2606_s12 + $0x10] sm:$0xff] }
 0x11f   :  { %v1857_v13 = vld [vmem:[%s2607_s14 + $0x18] sm:$0xff]  ;;  %v1849_v16 = vld [vmem:[%s2606_s12 + $0x8] sm:$0xff] }
 0x120   :  { %v1888_v17 = vpop.eup %1887  ;;  %1889 = vtanh.f32 %v300_v15  ;;  %v1856_v15 = vld [vmem:[%s2607_s14 + $0x10] sm:$0xff] }
 0x121   :  { %v332_v18 = vpack.c.bf16 %v1888_v17, %v1888_v17  ;;  %844 = vmatpush.bf16.msra.mxu0 %v1858_v11  ;;  %945 = vmatpush.bf16.msra.mxu2 %v1852_v10  ;;  %v1855_v17 = vld [vmem:[%s2607_s14 + $0x8] sm:$0xff] }
 0x123   :  { %v288_v19 = vpop.f32.mrf.mxu2  ;;  %1601 = vmatmul.msk.bf16.vlgmr.msra.gmra.mxu1 %vm266_vm2, %v332_v18 }
 0x124   :  { %v301_v20 = vpop.f32.mrf.mxu3  ;;  %929 = vmatpush.bf16.msra.mxu1 %v713_v42  ;;  %v1854_v19 = vld [vmem:[%s2607_s14] sm:$0xff] }
 0x125   :  { %845 = vmatpush.bf16.msra.mxu0 %v1857_v13  ;;  %946 = vmatpush.bf16.msra.mxu2 %v1851_v12 }
 0x126   :  { %v1890_v21 = vpop.eup %1889 }
 0x127   :  { %v331_v22 = vpack.c.bf16 %v1890_v21, %v1890_v21  ;;  %v2389_v21 = vld [vmem:[%s2603_s11] ss:$0 sm:$0xff] }
 0x129   :  { %451 = vmatmul.bf16.vlgmr.msrb.gmra.mxu3 %v331_v22  ;;  %584 = vmatmul.bf16.vlgmr.msrb.gmra.mxu2 %v331_v22 }
 0x12a   :  { %783 = vmatpush.bf16.msrb.mxu3 %v780_v6  ;;  %846 = vmatpush.bf16.msra.mxu0 %v1856_v15 }
 0x12b   :  { %947 = vmatpush.bf16.msra.mxu2 %v1850_v14 }
 0x12e   :  { %784 = vmatpush.bf16.msrb.mxu3 %v1853_v8  ;;  %847 = vmatpush.bf16.msra.mxu0 %v1855_v17 }
 0x12f   :  { %948 = vmatpush.bf16.msra.mxu2 %v1849_v16 }
 0x132   :  { %785 = vmatpush.bf16.msrb.mxu3 %v1852_v10  ;;  %848 = vmatpush.bf16.msra.mxu0 %v1854_v19 }
 0x136   :  { %786 = vmatpush.bf16.msrb.mxu3 %v1851_v12 }
 0x139   :  { %1650 = vmatmul.msk.bf16.vlgmr.msra.gmra.mxu3 %vm266_vm2, %v332_v18  ;;  %v1848_v18 = vld [vmem:[%s2606_s12] sm:$0xff] }
 0x13a   :  { %787 = vmatpush.bf16.msrb.mxu3 %v1850_v14  ;;  %949 = vmatpush.bf16.msra.mxu2 %v1848_v18 }
 0x13e   :  { %788 = vmatpush.bf16.msrb.mxu3 %v1849_v16 }
 0x142   :  { %789 = vmatpush.bf16.msrb.mxu3 %v1848_v18 }
 0x1a0   :  { %v465_v28 = vpop.f32.mrf.mxu1 }
 0x1a8   :  { %v467_v30 = vpop.f32.mrf.mxu1 }
 0x1ac   :  { %v452_v31 = vpop.f32.mrf.mxu3  ;;  %v585_v32 = vpop.f32.mrf.mxu2 }
 0x1ad   :  { %v586_v36 = vadd.f32 %v1876_v35, %v585_v32  ;;  %v453_v47 = vadd.f32 %v1875_v46, %v452_v31 }
 0x1af   :  { %v466_v49 = vadd.f32 %v465_v28, %v453_v47  ;;  %v2398_v28 = vld [vmem:[%s2605_s15] ss:$0 sm:$0xff] }
 0x1b4   :  { %v454_v33 = vpop.f32.mrf.mxu3  ;;  %v587_v34 = vpop.f32.mrf.mxu2 }
 0x1bc   :  { %v598_v37 = vpop.f32.mrf.mxu3 }
 0x1bd   :  { %v599_v38 = vadd.f32 %v598_v37, %v586_v36 }
 0x1bf   :  { %v602_v40 = vmul.f32 0.5, %v599_v38  ;;  %v632_v41 = vsel %vm631_vm4, %v599_v38, 0.0 }
 0x1c0   :  { %633 = vadd.xlane.f32.xlu2 %v632_v41 }
 0x1c1   :  { %v603_v43 = vmul.f32 1.442695, %v602_v40 }
 0x1c3   :  { %1891 = vpow2.f32 %v603_v43 }
 0x1c4   :  { %v600_v44 = vpop.f32.mrf.mxu3 }
 0x1c9   :  { %v1892_v45 = vpop.eup %1891 }
 0x1ca   :  { %608 = vst [vmem:[#allocation1] ss:$2 sm:$0xff] %v1892_v45 }
 0x1cb   :  { %610 = vst [vmem:[#allocation1 + $0x1] ss:$2 sm:$0xff] %v1892_v45 }
 0x1cc   :  { %612 = vst [vmem:[#allocation1 + $0x10] ss:$2 sm:$0xff] %v1892_v45 }
 0x1d2   :  { %v613_v50 = vld.sshfl [vmem:[#allocation1] sm:$0xff pattern:$0x75316420] }
 0x1d3   :  { %620 = vst [vmem:[#allocation1] ss:$2 sm:$0xff] %v466_v49  ;;  %v614_v51 = vld.sshfl [vmem:[#allocation1 + $0x10] sm:$0xff pattern:$0x75316420]  ;;  %v617_v53 = vmul.f32 %v613_v50, %v605_v23 }
 0x1d4   :  { %622 = vst [vmem:[#allocation1 + $0x1] ss:$2 sm:$0xff] %v466_v49  ;;  %v618_v56 = vmul.f32 %v614_v51, %v606_v26  ;;  %v2405_v51 = vld [vmem:[%s2608_s13] ss:$0 sm:$0xff] }
 0x1d5   :  { %624 = vst [vmem:[#allocation1 + $0x10] ss:$2 sm:$0xff] %v466_v49 }
 0x1db   :  { %v625_v57 = vld.sshfl [vmem:[#allocation1] sm:$0xff pattern:$0x75316420] }
 0x1dc   :  { %v626_v58 = vld.sshfl [vmem:[#allocation1 + $0x10] sm:$0xff pattern:$0x75316420]  ;;  %v2327_v59 = vadd.f32 %v625_v57, %v617_v53 }
 0x1dd   :  { %v2329_v60 = vadd.f32 %v626_v58, %v618_v56 }
 0x1de   :  { %v2333_v61 = vmul.f32 %v2325_v55, %v2327_v59 }
 0x1df   :  { %v2337_v62 = vmul.f32 %v2325_v55, %v2329_v60 }
 0x1e1   :  { %v705_v63 = vpack.c.bf16 %v2337_v62, %v2333_v61 }
 0x1e3   :  { %1652 = vmatmul.msk.bf16.vlgmr.msrb.gmra.mxu1 %vm638_vm3, %v705_v63 }
 0x1e4   :  { %957 = vmatpush.bf16.msrb.mxu1 %v839_v7 }
 0x1e8   :  { %958 = vmatpush.bf16.msrb.mxu1 %v1859_v9 }
 0x1ec   :  { %959 = vmatpush.bf16.msrb.mxu1 %v1858_v11 }
 0x1f0   :  { %960 = vmatpush.bf16.msrb.mxu1 %v1857_v13 }
 0x1f4   :  { %961 = vmatpush.bf16.msrb.mxu1 %v1856_v15 }
 0x1f8   :  { %962 = vmatpush.bf16.msrb.mxu1 %v1855_v17 }
 0x1fc   :  { %963 = vmatpush.bf16.msrb.mxu1 %v1854_v19 }
 0x260   :  { %v724_v20 = vpop.f32.mrf.mxu1 }
 0x261   :  { %v725_v22 = vadd.f32 %v2389_v21, %v724_v20 }
 0x263   :  { %1893 = vtanh.f32 %v725_v22 }
 0x268   :  { %v726_v23 = vpop.f32.mrf.mxu1 }
 0x269   :  { %v727_v24 = vadd.f32 %v2389_v21, %v726_v23  ;;  %v1894_v25 = vpop.eup %1893 }
 0x26b   :  { %1895 = vtanh.f32 %v727_v24 }
 0x271   :  { %v1896_v26 = vpop.eup %1895 }
 0x272   :  { %v731_v27 = vpack.c.bf16 %v1896_v26, %v1894_v25 }
 0x274   :  { %1677 = vmatmul.msk.bf16.vlgmr.msrb.gmra.mxu3 %vm774_vm7, %v731_v27  ;;  %1702 = vmatmul.msk.bf16.vlgmr.msra.gmra.mxu0 %vm774_vm7, %v731_v27 }
 0x2f1   :  { %v850_v29 = vpop.f32.mrf.mxu0 }
 0x2f2   :  { %v851_v30 = vadd.f32 %v2398_v28, %v850_v29 }
 0x2f4   :  { %v855_v31 = vadd.f32 5.0, %v851_v30 }
 0x2f6   :  { %v1703_v32 = vmul.f32 -1.442695, %v855_v31 }
 0x2f7   :  { %v791_v47 = vpop.f32.mrf.mxu3 }
 0x2f8   :  { %1897 = vpow2.f32 %v1703_v32  ;;  %v792_v63 = vadd.f32 %v2405_v51, %v791_v47 }
 0x2f9   :  { %v852_v33 = vpop.f32.mrf.mxu0 }
 0x2fa   :  { %v853_v34 = vadd.f32 %v2398_v28, %v852_v33 }
 0x2fc   :  { %v856_v35 = vadd.f32 5.0, %v853_v34 }
 0x2fe   :  { %v1898_v36 = vpop.eup %1897  ;;  %v1704_v37 = vmul.f32 -1.442695, %v856_v35 }
 0x2ff   :  { %v863_v38 = vadd.f32 1.0, %v1898_v36  ;;  %v793_v5 = vpop.f32.mrf.mxu3 }
 0x300   :  { %1899 = vpow2.f32 %v1704_v37  ;;  %v794_v11 = vadd.f32 %v2405_v51, %v793_v5 }
 0x301   :  { %1901 = vrcp.f32 %v863_v38  ;;  %v876_v44 = vand.u32 2147483648, %v863_v38  ;;  %v874_v46 = vand.u32 2147483647, %v863_v38  ;;  %vm870_vm9 = vweird.f32 %v863_v38 }
 0x303   :  { %v877_v50 = vor.u32 1.1754944e-38, %v876_v44  ;;  %vm875_vm11 = vcmp.eq.f32.partialorder %v874_v46, 8.507059e+37 }
 0x306   :  { %v1900_v39 = vpop.eup %1899 }
 0x307   :  { %v1902_v40 = vpop.eup %1901  ;;  %v864_v41 = vadd.f32 1.0, %v1900_v39 }
 0x308   :  { %v866_v42 = vmul.f32 %v1902_v40, %v863_v38  ;;  %vm871_vm8 = vweird.f32 %v1902_v40 }
 0x309   :  { %1903 = vrcp.f32 %v864_v41  ;;  %vm872_vm10 = vmor %vm870_vm9, %vm871_vm8  ;;  %v891_v58 = vand.u32 2147483648, %v864_v41  ;;  %v889_v1 = vand.u32 2147483647, %v864_v41  ;;  %vm885_vm13 = vweird.f32 %v864_v41 }
 0x30a   :  { %v867_v43 = vsub.f32 1.0, %v866_v42 }
 0x30b   :  { %v892_v6 = vor.u32 1.1754944e-38, %v891_v58  ;;  %vm890_vm15 = vcmp.eq.f32.partialorder %v889_v1, 8.507059e+37 }
 0x30c   :  { %v868_v45 = vmul.f32 %v1902_v40, %v867_v43 }
 0x30e   :  { %v869_v48 = vadd.f32 %v1902_v40, %v868_v45 }
 0x30f   :  { %v1904_v49 = vpop.eup %1903 }
 0x310   :  { %v873_v52 = vsel %vm872_vm10, %v1902_v40, %v869_v48  ;;  %v881_v53 = vmul.f32 %v1904_v49, %v864_v41  ;;  %vm886_vm12 = vweird.f32 %v1904_v49  ;;  %v1710_v41 = vld [vmem:[%s2604_s10 + $0x4] sm:$0xf] }
 0x311   :  { %v878_v54 = vsel %vm875_vm11, %v877_v50, %v873_v52  ;;  %vm887_vm14 = vmor %vm885_vm13, %vm886_vm12  ;;  %v1081_v42 = vsel %vm270_vm1, %v1710_v41, 0  ;;  %v1868_v41 = vld [vmem:[%s2607_s14 + $0x44] sm:$0xff] }
 0x312   :  { %v896_v56 = vmul.f32 %v878_v54, %v2327_v59  ;;  %v882_v57 = vsub.f32 1.0, %v881_v53  ;;  %1905 = vlog2.f32 %v878_v54  ;;  %1090 = vmatpush.bf16.msra.mxu3 %v1081_v42 }
 0x314   :  { %v883_v0 = vmul.f32 %v1904_v49, %v882_v57  ;;  %v898_v3 = vadd.f32 %v896_v56, %v792_v63 }
 0x316   :  { %v884_v4 = vadd.f32 %v1904_v49, %v883_v0  ;;  %v900_v10 = vmul.f32 %v898_v3, %v2410_v2  ;;  %1294 = vmatpush.bf16.msrb.mxu3 %v1081_v42  ;;  %v1861_v42 = vld [vmem:[%s2606_s12 + $0x3c] sm:$0xff] }
 0x318   :  { %v1906_v7 = vpop.eup %1905  ;;  %v888_v8 = vsel %vm887_vm14, %v1904_v49, %v884_v4  ;;  %v902_v16 = vadd.f32 %v900_v10, %v2333_v61 }
 0x319   :  { %v893_v59 = vsel %vm890_vm15, %v892_v6, %v888_v8  ;;  %v905_v9 = vmul.f32 0.6931472, %v1906_v7  ;;  %v2446_v6 = vsub.f32 1.0, %v2410_v2 }
 0x31a   :  { %v897_v12 = vmul.f32 %v893_v59, %v2329_v60  ;;  %1907 = vlog2.f32 %v893_v59  ;;  %v2423_v22 = vmul.f32 %v902_v16, %v2410_v2 }
 0x31b   :  { %v908_v13 = vmul.f32 %v905_v9, %v2410_v2 }
 0x31c   :  { %v899_v14 = vadd.f32 %v897_v12, %v794_v11 }
 0x31d   :  { %v910_v15 = vsel %vm638_vm3, %v908_v13, 0.0 }
 0x31e   :  { %v901_v17 = vmul.f32 %v899_v14, %v2410_v2  ;;  %911 = vadd.xlane.f32.xlu0 %v910_v15 }
 0x320   :  { %v1908_v18 = vpop.eup %1907  ;;  %v2420_v19 = vadd.f32 %v901_v17, %v2337_v62 }
 0x321   :  { %v907_v20 = vmul.f32 0.6931472, %v1908_v18 }
 0x322   :  { %v2427_v60 = vmul.f32 %v2420_v19, %v2410_v2 }
 0x323   :  { %v909_v23 = vmul.f32 %v907_v20, %v2410_v2 }
 0x324   :  { %v918_v61 = vpack.c.bf16 %v2427_v60, %v2423_v22 }
 0x325   :  { %v913_v24 = vsel %vm631_vm4, %v909_v23, 0.0 }
 0x326   :  { %914 = vadd.xlane.f32.xlu0 %v913_v24  ;;  %1705 = vmatmul.msk.bf16.vlgmr.msra.gmra.mxu1 %vm638_vm3, %v918_v61 }
 0x3a3   :  { %v931_v62 = vpop.f32.mrf.mxu1 }
 0x3a4   :  { %v932_v25 = vadd.f32 %v2389_v21, %v931_v62 }
 0x3a6   :  { %1909 = vtanh.f32 %v932_v25 }
 0x3ab   :  { %v933_v26 = vpop.f32.mrf.mxu1 }
 0x3ac   :  { %v934_v27 = vadd.f32 %v2389_v21, %v933_v26  ;;  %v1910_v29 = vpop.eup %1909 }
 0x3ae   :  { %1911 = vtanh.f32 %v934_v27 }
 0x3b4   :  { %v1912_v30 = vpop.eup %1911 }
 0x3b5   :  { %v938_v31 = vpack.c.bf16 %v1912_v30, %v1910_v29  ;;  %v1738_v29 = vld [vmem:[%s2607_s14 + $0x64] sm:$0x3] }
 0x3b6   :  { %v1190_v30 = vunpack.c.l.b16 %v1738_v29 }
 0x3b7   :  { %1706 = vmatmul.msk.bf16.vlgmr.msra.gmra.mxu2 %vm774_vm7, %v938_v31  ;;  %1707 = vmatmul.msk.bf16.vlgmr.msrb.gmra.mxu1 %vm774_vm7, %v938_v31 }
 0x434   :  { %v965_v32 = vpop.f32.mrf.mxu1 }
 0x435   :  { %v966_v33 = vadd.f32 %v2398_v28, %v965_v32  ;;  %v1197_v32 = vpack.c.b16 %v1190_v30, %v1190_v30 }
 0x437   :  { %v970_v34 = vadd.f32 5.0, %v966_v33 }
 0x439   :  { %v1708_v35 = vmul.f32 -1.442695, %v970_v34  ;;  %v1205_v34 = vsel %vm778_vm6, %v1197_v32, 0 }
 0x43a   :  { %v951_v50 = vpop.f32.mrf.mxu2  ;;  %1208 = vmatpush.bf16.msrb.mxu2 %v1205_v34 }
 0x43b   :  { %1913 = vpow2.f32 %v1708_v35  ;;  %v952_v3 = vadd.f32 %v2405_v51, %v951_v50  ;;  %v1865_v35 = vld [vmem:[%s2606_s12 + $0x5c] sm:$0xff] }
 0x43c   :  { %v967_v36 = vpop.f32.mrf.mxu1 }
 0x43d   :  { %v968_v37 = vadd.f32 %v2398_v28, %v967_v36  ;;  %v1871_v36 = vld [vmem:[%s2607_s14 + $0x5c] sm:$0xff] }
 0x43e   :  { %1209 = vmatpush.bf16.msrb.mxu2 %v1871_v36 }
 0x43f   :  { %v971_v38 = vadd.f32 5.0, %v968_v37  ;;  %v1864_v37 = vld [vmem:[%s2606_s12 + $0x54] sm:$0xff] }
 0x441   :  { %v1914_v21 = vpop.eup %1913  ;;  %v1709_v39 = vmul.f32 -1.442695, %v971_v38  ;;  %v1870_v38 = vld [vmem:[%s2607_s14 + $0x54] sm:$0xff] }
 0x442   :  { %v978_v40 = vadd.f32 1.0, %v1914_v21  ;;  %v953_v59 = vpop.f32.mrf.mxu2  ;;  %1210 = vmatpush.bf16.msrb.mxu2 %v1870_v38  ;;  %v1863_v21 = vld [vmem:[%s2606_s12 + $0x4c] sm:$0xff] }
 0x443   :  { %1915 = vpow2.f32 %v1709_v39  ;;  %v954_v15 = vadd.f32 %v2405_v51, %v953_v59  ;;  %v1869_v39 = vld [vmem:[%s2607_s14 + $0x4c] sm:$0xff] }
 0x444   :  { %1917 = vrcp.f32 %v978_v40  ;;  %v991_v47 = vand.u32 2147483648, %v978_v40  ;;  %v989_v49 = vand.u32 2147483647, %v978_v40  ;;  %vm985_vm2 = vweird.f32 %v978_v40 }
 0x446   :  { %v992_v54 = vor.u32 1.1754944e-38, %v991_v47  ;;  %vm990_vm1 = vcmp.eq.f32.partialorder %v989_v49, 8.507059e+37  ;;  %1211 = vmatpush.bf16.msrb.mxu2 %v1869_v39 }
 0x449   :  { %v1916_v43 = vpop.eup %1915 }
 0x44a   :  { %v1918_v44 = vpop.eup %1917  ;;  %v979_v45 = vadd.f32 1.0, %v1916_v43  ;;  %1212 = vmatpush.bf16.msrb.mxu2 %v1868_v41  ;;  %v1867_v43 = vld [vmem:[%s2607_s14 + $0x3c] sm:$0xff] }
 0x44b   :  { %v981_v46 = vmul.f32 %v1918_v44, %v978_v40  ;;  %vm986_vm0 = vweird.f32 %v1918_v44  ;;  %v1862_v40 = vld [vmem:[%s2606_s12 + $0x44] sm:$0xff] }
 0x44c   :  { %1919 = vrcp.f32 %v979_v45  ;;  %vm987_vm5 = vmor %vm985_vm2, %vm986_vm0  ;;  %v1006_v1 = vand.u32 2147483648, %v979_v45  ;;  %v1004_v5 = vand.u32 2147483647, %v979_v45  ;;  %vm1000_vm9 = vweird.f32 %v979_v45 }
 0x44d   :  { %v982_v28 = vsub.f32 1.0, %v981_v46 }
 0x44e   :  { %v1007_v9 = vor.u32 1.1754944e-38, %v1006_v1  ;;  %vm1005_vm11 = vcmp.eq.f32.partialorder %v1004_v5, 8.507059e+37  ;;  %1213 = vmatpush.bf16.msrb.mxu2 %v1867_v43 }
 0x44f   :  { %v983_v48 = vmul.f32 %v1918_v44, %v982_v28  ;;  %v2520_v28 = vld [vmem:[%s2603_s11 + $0x1] ss:$0 sm:$0xff] }
 0x451   :  { %v984_v52 = vadd.f32 %v1918_v44, %v983_v48 }
 0x452   :  { %v1920_v53 = vpop.eup %1919 }
 0x453   :  { %v988_v56 = vsel %vm987_vm5, %v1918_v44, %v984_v52  ;;  %v996_v57 = vmul.f32 %v1920_v53, %v979_v45  ;;  %vm1001_vm8 = vweird.f32 %v1920_v53  ;;  %v1860_v44 = vld [vmem:[%s2606_s12 + $0x34] sm:$0xff] }
 0x454   :  { %v993_v58 = vsel %vm990_vm1, %v992_v54, %v988_v56  ;;  %vm1002_vm10 = vmor %vm1000_vm9, %vm1001_vm8  ;;  %v1866_v45 = vld [vmem:[%s2607_s14 + $0x34] sm:$0xff]  ;;  %v2529_v54 = vld [vmem:[%s2605_s15 + $0x1] ss:$0 sm:$0xff] }
 0x455   :  { %v1011_v63 = vmul.f32 %v993_v58, %v902_v16  ;;  %v997_v0 = vsub.f32 1.0, %v996_v57  ;;  %1921 = vlog2.f32 %v993_v58  ;;  %1214 = vmatpush.bf16.msrb.mxu2 %v1866_v45 }
 0x457   :  { %v998_v4 = vmul.f32 %v1920_v53, %v997_v0  ;;  %v1013_v7 = vadd.f32 %v1011_v63, %v952_v3 }
 0x459   :  { %v999_v8 = vadd.f32 %v1920_v53, %v998_v4  ;;  %v1015_v14 = vmul.f32 %v1013_v7, %v2446_v6 }
 0x45b   :  { %v1922_v10 = vpop.eup %1921  ;;  %v1003_v11 = vsel %vm1002_vm10, %v1920_v53, %v999_v8  ;;  %v2454_v23 = vadd.f32 %v1015_v14, %v2423_v22 }
 0x45c   :  { %v1008_v12 = vsel %vm1005_vm11, %v1007_v9, %v1003_v11  ;;  %v1020_v13 = vmul.f32 0.6931472, %v1922_v10 }
 0x45d   :  { %v1012_v16 = vmul.f32 %v1008_v12, %v2420_v19  ;;  %1923 = vlog2.f32 %v1008_v12  ;;  %v2462_v51 = vmul.f32 %v2325_v55, %v2454_v23 }
 0x45e   :  { %v1023_v17 = vmul.f32 %v1020_v13, %v2446_v6 }
 0x45f   :  { %v1014_v18 = vadd.f32 %v1012_v16, %v954_v15 }
 0x460   :  { %v1025_v20 = vsel %vm638_vm3, %v1023_v17, 0.0 }
 0x461   :  { %v1016_v61 = vmul.f32 %v1014_v18, %v2446_v6  ;;  %1026 = vadd.xlane.f32.xlu1 %v1025_v20  ;;  %v2536_v20 = vld [vmem:[%s2608_s13 + $0x1] ss:$0 sm:$0xff] }
 0x463   :  { %v1924_v24 = vpop.eup %1923  ;;  %v2458_v62 = vadd.f32 %v1016_v61, %v2427_v60  ;;  %v1724_v60 = vld [vmem:[%s2606_s12 + $0x64] sm:$0x3] }
 0x464   :  { %v1022_v25 = vmul.f32 0.6931472, %v1924_v24 }
 0x465   :  { %v2466_v19 = vmul.f32 %v2325_v55, %v2458_v62  ;;  %v1128_v55 = vunpack.c.l.b16 %v1724_v60 }
 0x466   :  { %v1024_v26 = vmul.f32 %v1022_v25, %v2446_v6 }
 0x467   :  { %v1073_v22 = vpack.c.bf16 %v2466_v19, %v2462_v51  ;;  %v1135_v31 = vpack.c.b16 %v1128_v55, %v1128_v55 }
 0x468   :  { %v1028_v27 = vsel %vm631_vm4, %v1024_v26, 0.0 }
 0x469   :  { %1029 = vadd.xlane.f32.xlu1 %v1028_v27  ;;  %1740 = vmatmul.msk.bf16.vlgmr.msra.gmra.mxu3 %vm638_vm3, %v1073_v22  ;;  %v1146_v33 = vsel %vm778_vm6, %v1135_v31, 0 }
 0x46a   :  { %1149 = vmatpush.bf16.msrb.mxu0 %v1146_v33  ;;  %1308 = vmatpush.bf16.msra.mxu1 %v1146_v33 }
 0x46e   :  { %1150 = vmatpush.bf16.msrb.mxu0 %v1865_v35  ;;  %1309 = vmatpush.bf16.msra.mxu1 %v1865_v35 }
 0x472   :  { %1151 = vmatpush.bf16.msrb.mxu0 %v1864_v37  ;;  %1310 = vmatpush.bf16.msra.mxu1 %v1864_v37 }
 0x476   :  { %1152 = vmatpush.bf16.msrb.mxu0 %v1863_v21  ;;  %1311 = vmatpush.bf16.msra.mxu1 %v1863_v21 }
 0x47a   :  { %1153 = vmatpush.bf16.msrb.mxu0 %v1862_v40  ;;  %1312 = vmatpush.bf16.msra.mxu1 %v1862_v40 }
 0x47e   :  { %1154 = vmatpush.bf16.msrb.mxu0 %v1861_v42  ;;  %1313 = vmatpush.bf16.msra.mxu1 %v1861_v42 }
 0x482   :  { %1155 = vmatpush.bf16.msrb.mxu0 %v1860_v44  ;;  %1314 = vmatpush.bf16.msra.mxu1 %v1860_v44 }
 0x486   :  { %1322 = vmatpush.bf16.msra.mxu0 %v1205_v34 }
 0x48a   :  { %1323 = vmatpush.bf16.msra.mxu0 %v1871_v36 }
 0x48e   :  { %1324 = vmatpush.bf16.msra.mxu0 %v1870_v38 }
 0x492   :  { %1325 = vmatpush.bf16.msra.mxu0 %v1869_v39 }
 0x496   :  { %1326 = vmatpush.bf16.msra.mxu0 %v1868_v41 }
 0x49a   :  { %1327 = vmatpush.bf16.msra.mxu0 %v1867_v43 }
 0x49e   :  { %1328 = vmatpush.bf16.msra.mxu0 %v1866_v45 }
 0x4ec   :  { %v1092_v46 = vpop.f32.mrf.mxu3 }
 0x4ed   :  { %v1093_v47 = vadd.f32 %v2520_v28, %v1092_v46 }
 0x4ef   :  { %1925 = vtanh.f32 %v1093_v47 }
 0x4f4   :  { %v1094_v48 = vpop.f32.mrf.mxu3 }
 0x4f5   :  { %v1095_v49 = vadd.f32 %v2520_v28, %v1094_v48  ;;  %v1926_v50 = vpop.eup %1925 }
 0x4f7   :  { %1927 = vtanh.f32 %v1095_v49 }
 0x4fd   :  { %v1928_v52 = vpop.eup %1927 }
 0x4fe   :  { %v1099_v53 = vpack.c.bf16 %v1928_v52, %v1926_v50 }
 0x500   :  { %1765 = vmatmul.msk.bf16.vlgmr.msrb.gmra.mxu0 %vm774_vm7, %v1099_v53  ;;  %1790 = vmatmul.msk.bf16.vlgmr.msrb.gmra.mxu2 %vm774_vm7, %v1099_v53 }
 0x57d   :  { %v1157_v15 = vpop.f32.mrf.mxu0 }
 0x57e   :  { %v1158_v60 = vadd.f32 %v2536_v20, %v1157_v15 }
 0x583   :  { %v1216_v56 = vpop.f32.mrf.mxu2 }
 0x584   :  { %v1217_v57 = vadd.f32 %v2529_v54, %v1216_v56 }
 0x585   :  { %v1159_v32 = vpop.f32.mrf.mxu0 }
 0x586   :  { %v1221_v58 = vadd.f32 5.0, %v1217_v57  ;;  %v1160_v38 = vadd.f32 %v2536_v20, %v1159_v32 }
 0x588   :  { %v1791_v63 = vmul.f32 -1.442695, %v1221_v58 }
 0x58a   :  { %1929 = vpow2.f32 %v1791_v63 }
 0x58b   :  { %v1218_v0 = vpop.f32.mrf.mxu2 }
 0x58c   :  { %v1219_v1 = vadd.f32 %v2529_v54, %v1218_v0 }
 0x58e   :  { %v1222_v3 = vadd.f32 5.0, %v1219_v1 }
 0x590   :  { %v1930_v4 = vpop.eup %1929  ;;  %v1792_v5 = vmul.f32 -1.442695, %v1222_v3 }
 0x591   :  { %v1229_v7 = vadd.f32 1.0, %v1930_v4 }
 0x592   :  { %1931 = vpow2.f32 %v1792_v5 }
 0x593   :  { %1933 = vrcp.f32 %v1229_v7  ;;  %v1242_v12 = vand.u32 2147483648, %v1229_v7  ;;  %v1240_v14 = vand.u32 2147483647, %v1229_v7  ;;  %vm1236_vm12 = vweird.f32 %v1229_v7 }
 0x595   :  { %v1243_v18 = vor.u32 1.1754944e-38, %v1242_v12  ;;  %vm1241_vm14 = vcmp.eq.f32.partialorder %v1240_v14, 8.507059e+37 }
 0x598   :  { %v1932_v8 = vpop.eup %1931 }
 0x599   :  { %v1934_v59 = vpop.eup %1933  ;;  %v1230_v9 = vadd.f32 1.0, %v1932_v8 }
 0x59a   :  { %v1232_v10 = vmul.f32 %v1934_v59, %v1229_v7  ;;  %vm1237_vm6 = vweird.f32 %v1934_v59 }
 0x59b   :  { %1935 = vrcp.f32 %v1230_v9  ;;  %vm1238_vm13 = vmor %vm1236_vm12, %vm1237_vm6  ;;  %v1257_v27 = vand.u32 2147483648, %v1230_v9  ;;  %v1255_v55 = vand.u32 2147483647, %v1230_v9  ;;  %vm1251_vm0 = vweird.f32 %v1230_v9 }
 0x59c   :  { %v1233_v11 = vsub.f32 1.0, %v1232_v10 }
 0x59d   :  { %v1258_v33 = vor.u32 1.1754944e-38, %v1257_v27  ;;  %vm1256_vm5 = vcmp.eq.f32.partialorder %v1255_v55, 8.507059e+37 }
 0x59e   :  { %v1234_v13 = vmul.f32 %v1934_v59, %v1233_v11 }
 0x5a0   :  { %v1235_v16 = vadd.f32 %v1934_v59, %v1234_v13 }
 0x5a1   :  { %v1936_v17 = vpop.eup %1935 }
 0x5a2   :  { %v1247_v61 = vmul.f32 %v1936_v17, %v1230_v9  ;;  %v1239_v24 = vsel %vm1238_vm13, %v1934_v59, %v1235_v16  ;;  %vm1252_vm15 = vweird.f32 %v1936_v17 }
 0x5a3   :  { %v1244_v25 = vsel %vm1241_vm14, %v1243_v18, %v1239_v24  ;;  %vm1253_vm2 = vmor %vm1251_vm0, %vm1252_vm15 }
 0x5a4   :  { %v1248_v26 = vsub.f32 1.0, %v1247_v61  ;;  %1937 = vlog2.f32 %v1244_v25  ;;  %v1261_v22 = vmul.f32 %v1244_v25, %v2454_v23 }
 0x5a6   :  { %v1249_v29 = vmul.f32 %v1936_v17, %v1248_v26  ;;  %v1263_v30 = vadd.f32 %v1261_v22, %v1158_v60 }
 0x5a8   :  { %v1250_v31 = vadd.f32 %v1936_v17, %v1249_v29  ;;  %v1265_v23 = vmul.f32 %v1263_v30, %v2410_v2 }
 0x5aa   :  { %v1938_v34 = vpop.eup %1937  ;;  %v1254_v35 = vsel %vm1253_vm2, %v1936_v17, %v1250_v31  ;;  %v1267_v42 = vadd.f32 %v1265_v23, %v2462_v51 }
 0x5ab   :  { %v1270_v36 = vmul.f32 0.6931472, %v1938_v34  ;;  %v1259_v37 = vsel %vm1256_vm5, %v1258_v33, %v1254_v35 }
 0x5ac   :  { %1939 = vlog2.f32 %v1259_v37  ;;  %v1262_v21 = vmul.f32 %v1259_v37, %v2458_v62  ;;  %v2551_v47 = vmul.f32 %v1267_v42, %v2410_v2 }
 0x5ad   :  { %v1273_v39 = vmul.f32 %v1270_v36, %v2410_v2 }
 0x5ae   :  { %v1264_v40 = vadd.f32 %v1262_v21, %v1160_v38 }
 0x5af   :  { %v1275_v41 = vsel %vm638_vm3, %v1273_v39, 0.0 }
 0x5b0   :  { %1276 = vadd.xlane.f32.xlu1 %v1275_v41  ;;  %v1266_v43 = vmul.f32 %v1264_v40, %v2410_v2 }
 0x5b2   :  { %v1940_v44 = vpop.eup %1939  ;;  %v2548_v45 = vadd.f32 %v1266_v43, %v2466_v19 }
 0x5b3   :  { %v1272_v46 = vmul.f32 0.6931472, %v1940_v44 }
 0x5b4   :  { %v2555_v62 = vmul.f32 %v2548_v45, %v2410_v2 }
 0x5b5   :  { %v1274_v48 = vmul.f32 %v1272_v46, %v2410_v2 }
 0x5b6   :  { %v1283_v49 = vpack.c.bf16 %v2555_v62, %v2551_v47 }
 0x5b7   :  { %v1278_v51 = vsel %vm631_vm4, %v1274_v48, 0.0  ;;  %v644_v48 = vpop.xlane.xlu0 %643 }
 0x5b8   :  { %1279 = vadd.xlane.f32.xlu2 %v1278_v51  ;;  %1793 = vmatmul.msk.bf16.vlgmr.msrb.gmra.mxu3 %vm638_vm3, %v1283_v49  ;;  %v1027_v49 = vpop.xlane.xlu1 %1026  ;;  %v641_v51 = vpop.xlane.xlu2 %640 }
 0x63b   :  { %v1296_v19 = vpop.f32.mrf.mxu3 }
 0x63c   :  { %v1297_v50 = vadd.f32 %v2520_v28, %v1296_v19  ;;  %v912_v19 = vpop.xlane.xlu0 %911 }
 0x63e   :  { %1941 = vtanh.f32 %v1297_v50  ;;  %v1958_v50 = vmov 839922192  }
 0x643   :  { %v1298_v52 = vpop.f32.mrf.mxu3 }
 0x644   :  { %v1299_v53 = vadd.f32 %v2520_v28, %v1298_v52  ;;  %v1942_v56 = vpop.eup %1941  ;;  %v648_v52 = vunpack.c.l.s4 %v1958_v50 }
 0x646   :  { %1943 = vtanh.f32 %v1299_v53  ;;  %v1959_v53 = vmov 1985246804  }
 0x64c   :  { %v1944_v57 = vpop.eup %1943 }
 0x64d   :  { %v1303_v58 = vpack.c.bf16 %v1944_v57, %v1942_v56  ;;  %v652_v56 = vunpack.c.l.s4 %v1959_v53  ;;  %v649_v57 = vunpack.c.0.s8 %v648_v52 }
 0x64f   :  { %1794 = vmatmul.msk.bf16.vlgmr.msra.gmra.mxu1 %vm774_vm7, %v1303_v58  ;;  %1795 = vmatmul.msk.bf16.vlgmr.msra.gmra.mxu0 %vm774_vm7, %v1303_v58  ;;  %v653_v58 = vunpack.c.0.s8 %v652_v56 }
 0x6cc   :  { %v1330_v2 = vpop.f32.mrf.mxu0  ;;  %v1316_v16 = vpop.f32.mrf.mxu1 }
 0x6cd   :  { %v1331_v63 = vadd.f32 %v2529_v54, %v1330_v2  ;;  %v1317_v26 = vadd.f32 %v2536_v20, %v1316_v16  ;;  %v634_v2 = vpop.xlane.xlu2 %633 }
 0x6cf   :  { %v1335_v0 = vadd.f32 5.0, %v1331_v63  ;;  %v915_v63 = vpop.xlane.xlu0 %914 }
 0x6d1   :  { %v1796_v1 = vmul.f32 -1.442695, %v1335_v0  ;;  %v650_v0 = vperm.slane %v641_v51, %v649_v57 }
 0x6d3   :  { %1945 = vpow2.f32 %v1796_v1  ;;  %v654_v1 = vperm.slane %v641_v51, %v653_v58 }
 0x6d4   :  { %v1332_v3 = vpop.f32.mrf.mxu0  ;;  %v1318_v33 = vpop.f32.mrf.mxu1 }
 0x6d5   :  { %v1333_v4 = vadd.f32 %v2529_v54, %v1332_v3  ;;  %v1319_v21 = vadd.f32 %v2536_v20, %v1318_v33  ;;  %v635_v3 = vadd.f32 14.703016, %v634_v2 }
 0x6d7   :  { %v1336_v5 = vadd.f32 5.0, %v1333_v4  ;;  %v1033_v4 = vadd.f32 %v1027_v49, %v912_v19 }
 0x6d9   :  { %v1946_v28 = vpop.eup %1945  ;;  %v1797_v7 = vmul.f32 -1.442695, %v1336_v5  ;;  %v662_v5 = vadd.f32 %v650_v0, %v635_v3 }
 0x6da   :  { %v1343_v8 = vadd.f32 1.0, %v1946_v28  ;;  %v663_v28 = vadd.f32 %v654_v1, %v635_v3 }
 0x6db   :  { %1947 = vpow2.f32 %v1797_v7 }
 0x6dc   :  { %1949 = vrcp.f32 %v1343_v8  ;;  %v1356_v13 = vand.u32 2147483648, %v1343_v8  ;;  %v1354_v15 = vand.u32 2147483647, %v1343_v8  ;;  %vm1350_vm1 = vweird.f32 %v1343_v8 }
 0x6de   :  { %v1357_v18 = vor.u32 1.1754944e-38, %v1356_v13  ;;  %vm1355_vm9 = vcmp.eq.f32.partialorder %v1354_v15, 8.507059e+37 }
 0x6e1   :  { %v1948_v59 = vpop.eup %1947 }
 0x6e2   :  { %v1950_v9 = vpop.eup %1949  ;;  %v1344_v10 = vadd.f32 1.0, %v1948_v59 }
 0x6e3   :  { %v1346_v11 = vmul.f32 %v1950_v9, %v1343_v8  ;;  %vm1351_vm7 = vweird.f32 %v1950_v9 }
 0x6e4   :  { %1951 = vrcp.f32 %v1344_v10  ;;  %vm1352_vm8 = vmor %vm1350_vm1, %vm1351_vm7  ;;  %v1371_v60 = vand.u32 2147483648, %v1344_v10  ;;  %v1369_v30 = vand.u32 2147483647, %v1344_v10  ;;  %vm1365_vm11 = vweird.f32 %v1344_v10 }
 0x6e5   :  { %v1347_v12 = vsub.f32 1.0, %v1346_v11  ;;  %v666_v11 = vmul.f32 -0.5, %v663_v28 }
 0x6e6   :  { %v1372_v34 = vor.u32 1.1754944e-38, %v1371_v60  ;;  %vm1370_vm12 = vcmp.eq.f32.partialorder %v1369_v30, 8.507059e+37 }
 0x6e7   :  { %v1348_v14 = vmul.f32 %v1950_v9, %v1347_v12 }
 0x6e9   :  { %v1349_v17 = vadd.f32 %v1950_v9, %v1348_v14  ;;  %v1280_v14 = vpop.xlane.xlu2 %1279 }
 0x6ea   :  { %v1952_v54 = vpop.eup %1951 }
 0x6eb   :  { %v1361_v61 = vmul.f32 %v1952_v54, %v1344_v10  ;;  %v1353_v24 = vsel %vm1352_vm8, %v1950_v9, %v1349_v17  ;;  %vm1366_vm10 = vweird.f32 %v1952_v54  ;;  %v658_v9 = vperm.slane %v644_v48, %v649_v57 }
 0x6ec   :  { %v1358_v25 = vsel %vm1355_vm9, %v1357_v18, %v1353_v24  ;;  %vm1367_vm6 = vmor %vm1365_vm11, %vm1366_vm10  ;;  %v665_v10 = vmul.f32 -0.5, %v662_v5 }
 0x6ed   :  { %v1362_v22 = vsub.f32 1.0, %v1361_v61  ;;  %1953 = vlog2.f32 %v1358_v25  ;;  %v1375_v27 = vmul.f32 %v1358_v25, %v1267_v42 }
 0x6ef   :  { %v1377_v29 = vadd.f32 %v1375_v27, %v1317_v26  ;;  %v1363_v55 = vmul.f32 %v1952_v54, %v1362_v22 }
 0x6f1   :  { %v1379_v31 = vmul.f32 %v1377_v29, %v2446_v6  ;;  %v1364_v32 = vadd.f32 %v1952_v54, %v1363_v55 }
 0x6f3   :  { %v1954_v35 = vpop.eup %1953  ;;  %v1381_v36 = vadd.f32 %v1379_v31, %v2551_v47  ;;  %v1368_v37 = vsel %vm1367_vm6, %v1952_v54, %v1364_v32  ;;  %v664_v54 = vadd.f32 %v658_v9, %v635_v3 }
 0x6f4   :  { %v1384_v38 = vmul.f32 0.6931472, %v1954_v35  ;;  %v1373_v23 = vsel %vm1370_vm12, %v1372_v34, %v1368_v37 }
 0x6f5   :  { %1399 = vst.msk [vmem:[%s2609_s16] sm:$0xff] %vm638_vm3, %v1381_v36  ;;  %1955 = vlog2.f32 %v1373_v23  ;;  %v1376_v39 = vmul.f32 %v1373_v23, %v2548_v45  ;;  %v667_v25 = vmul.f32 -0.5, %v664_v54 }
 0x6f6   :  { %v1387_v40 = vmul.f32 %v1384_v38, %v2446_v6 }
 0x6f7   :  { %v1378_v41 = vadd.f32 %v1376_v39, %v1319_v21 }
 0x6f8   :  { %v1389_v42 = vsel %vm638_vm3, %v1387_v40, 0.0  ;;  %vm1433_vm3 = vcmask 7168  }
 0x6f9   :  { %1390 = vadd.xlane.f32.xlu0 %v1389_v42  ;;  %v1380_v43 = vmul.f32 %v1378_v41, %v2446_v6 }
 0x6fb   :  { %v1956_v44 = vpop.eup %1955  ;;  %v1382_v46 = vadd.f32 %v1380_v43, %v2555_v62  ;;  %v1030_v62 = vpop.xlane.xlu1 %1029 }
 0x6fc   :  { %v1386_v20 = vmul.f32 0.6931472, %v1956_v44  ;;  %v1034_v15 = vadd.f32 %v1030_v62, %v915_v63 }
 0x6fd   :  { %1400 = vst.msk [vmem:[%s2609_s16 + $0x8] sm:$0xf] %vm631_vm4, %v1382_v46 }
 0x6fe   :  { %v1388_v47 = vmul.f32 %v1386_v20, %v2446_v6  ;;  %v1396_v18 = vadd.f32 %v1280_v14, %v1034_v15 }
 0x700   :  { %v1392_v45 = vsel %vm631_vm4, %v1388_v47, 0.0  ;;  %vm1435_vm4 = vcmask 3072  }
 0x701   :  { %1393 = vadd.xlane.f32.xlu1 %v1392_v45 }
 0x703   :  { %v1277_v6 = vpop.xlane.xlu1 %1276 }
 0x704   :  { %v1395_v7 = vadd.f32 %v1277_v6, %v1033_v4 }
 0x76c   :  { %v1391_v8 = vpop.xlane.xlu0 %1390 }
 0x76d   :  { %v1397_v59 = vadd.f32 %v1395_v7, %v1391_v8 }
 0x76f   :  { %v1406_v12 = vperm.slane %v1397_v59, %v649_v57  ;;  %v1410_v13 = vperm.slane %v1397_v59, %v653_v58 }
 0x771   :  { %v1418_v16 = vsub.f32 %v665_v10, %v1406_v12  ;;  %v1419_v17 = vsub.f32 %v666_v11, %v1410_v13 }
 0x773   :  { %1424 = vst [vmem:[#allocation1] ss:$2 sm:$0xff] %v1418_v16 }
 0x774   :  { %1426 = vst [vmem:[#allocation1 + $0x1] ss:$2 sm:$0xff] %v1419_v17  ;;  %v1394_v61 = vpop.xlane.xlu1 %1393 }
 0x775   :  { %v1398_v24 = vadd.f32 %v1396_v18, %v1394_v61 }
 0x777   :  { %v1414_v26 = vperm.slane %v1398_v24, %v649_v57 }
 0x779   :  { %v1420_v22 = vsub.f32 %v667_v25, %v1414_v26 }
 0x77b   :  { %v1429_v27 = vld.sshfl [vmem:[#allocation1] sm:$0xff pattern:$0x75316420]  ;;  %1428 = vst [vmem:[#allocation1 + $0x10] ss:$2 sm:$0xff] %v1420_v22 }
 0x77c   :  { %1434 = vst.msk [vmem:[%s2610_s17] sm:$0xff] %vm1433_vm3, %v1429_v27 }
 0x782   :  { %v1430_v60 = vld.sshfl [vmem:[#allocation1 + $0x10] sm:$0xff pattern:$0x75316420] }
 0x783   :  { %1436 = vst.msk [vmem:[%s2610_s17 + $0x8] sm:$0xf] %vm1435_vm4, %v1430_v60 }

</bundles_post_ra>
